<compile_context>
chip_gen: v7x
topology: tpu7x:2x2x1
jax: 0.10.0
libtpu: 0.0.40
codegen_flags: <defaults>
</compile_context>

<pallas_src>
import jax
import jax.numpy as jnp
from jax.experimental import pallas as pl
from jax.experimental.pallas import tpu as pltpu

LANE = 128


def _cdiv(a, b):
    return (a + b - 1) // b


def _round_up(x, m):
    return _cdiv(x, m) * m


def mlp_kernel(x_ref, w1_ref, b1_ref, w2_ref, b2_ref, w3_ref, b3_ref, o_ref):
    # x_ref : (1, pack, TS)        f32   `pack` batch sub-tiles, batch on lanes
    # w1_ref: (pack, 64, 1)        f32   Linear(1,64).weight tiled per sub-tile
    # b1_ref: (pack, 64, 1)        f32
    # w2_ref: (pack*64, pack*64)   bf16  blockdiag(W2, ..., W2)
    # b2_ref: (pack, 64, 1)        f32
    # w3_ref: (pack, 64, 1)        f32   Linear(64,1).weight as a tiled column
    # b3_ref: (1, 1)               f32   (SMEM scalar)
    # o_ref : (1, pack, TS)        f32
    pack, d, ts = x_ref.shape[1], w1_ref.shape[1], x_ref.shape[2]

    x = x_ref[0]                                                      # (pack, TS)

    # Layer 1: in_features == 1 -> broadcast outer product on the VPU (f32),
    # built directly in the block-stacked layout the MXU consumes.
    h1 = jnp.maximum(x[:, None, :] * w1_ref[...] + b1_ref[...], 0.0)  # (pack, d, TS)

    # Layer 2: block-diagonal (pack*64, pack*64) bf16 stationary weight ->
    # one full-width MXU matmul handles all `pack` sub-tiles (f32 accumulate).
    h2 = jnp.dot(w2_ref[...],
                 h1.astype(jnp.bfloat16).reshape(pack * d, ts),
                 preferred_element_type=jnp.float32)                  # (pack*d, TS)

    # b2 stays a VPU add: folding it into the matmul needs K = pack*d + 1,
    # i.e. a second MXU K-pass (2x stream time) -- worse than one add pass.
    h2 = jnp.maximum(h2.reshape(pack, d, ts) + b2_ref[...], 0.0)      # (pack, d, TS)

    # Layer 3 off the MXU: VPU multiply by the tiled w3 column, then a
    # sublane band-reduce over the 64 hidden rows of each sub-tile.
    y = jnp.sum(h2 * w3_ref[...], axis=1) + b3_ref[0, 0]              # (pack, TS)
    o_ref[0] = y


def simple_nn_forward(x, params, *, max_sub_tile=4096):
    """x: (N, 1) float32.  Returns (N, 1) float32."""
    n = x.shape[0]
    pack, d = params["w1_stack"].shape[0], params["w1_stack"].shape[1]

    # Sub-tile lane width: large enough to amortize the ~0.35us per-grid-step
    # overhead (pack*4096 elements/step at the cap), small enough to keep
    # per-step VMEM modest and to give >=2 grid steps (v7x has 2 TensorCores)
    # for all but tiny batches.
    ts = int(min(max_sub_tile, _round_up(_cdiv(max(n, 1), 2 * pack), LANE)))
    tile_b = pack * ts
    n_pad = _round_up(n, tile_b)
    groups = n_pad // tile_b

    # Free reshape into the (groups, pack, TS) lane-dense layout; the pad is a
    # copy only when N is not already tile-aligned.
    xt = x.reshape(-1)
    if n_pad != n:
        xt = jnp.pad(xt, (0, n_pad - n))
    xt = xt.reshape(groups, pack, ts)

    const3 = lambda shape: pl.BlockSpec(shape, lambda i: (0, 0, 0))

    out = pl.pallas_call(
        mlp_kernel,
        out_shape=jax.ShapeDtypeStruct((groups, pack, ts), jnp.float32),
        grid=(groups,),
        in_specs=[
            pl.BlockSpec((1, pack, ts), lambda i: (i, 0, 0)),      # x tile
            const3((pack, d, 1)),                                  # w1 stack (f32)
            const3((pack, d, 1)),                                  # b1 stack (f32)
            pl.BlockSpec((pack * d, pack * d), lambda i: (0, 0)),  # W2 block-diag (bf16)
            const3((pack, d, 1)),                                  # b2 stack (f32)
            const3((pack, d, 1)),                                  # w3 stack (f32)
            pl.BlockSpec(memory_space=pltpu.MemorySpace.SMEM),     # b3 scalar
        ],
        out_specs=pl.BlockSpec((1, pack, ts), lambda i: (i, 0, 0)),
        compiler_params=pltpu.CompilerParams(
            dimension_semantics=("parallel",),
            vmem_limit_bytes=32 * 1024 * 1024,
        ),
    )(xt, params["w1_stack"], params["b1_stack"], params["w2_big_bf16"],
      params["b2_stack"], params["w3_stack"], params["b3"])

    out = out.reshape(n_pad, 1)
    return out if n_pad == n else out[:n]


def init_params(key, *, pack=4):
    """Deterministic init mirroring nn.Linear's U(-1/sqrt(fan_in), 1/sqrt(fan_in)).

    pack = number of W2 copies on the MXU block diagonal:
      4 -> 256x256 stationary (fills the v6e/v7x MXU); 2 -> 128x128 (v5e).
    """
    ks = jax.random.split(key, 6)

    def uniform(k, shape, fan_in):
        bound = 1.0 / jnp.sqrt(jnp.asarray(fan_in, jnp.float32))
        return jax.random.uniform(k, shape, jnp.float32, -bound, bound)

    w1 = uniform(ks[0], (64, 1), 1.0)      # Linear(1, 64).weight
    b1 = uniform(ks[1], (64,), 1.0)
    w2 = uniform(ks[2], (64, 64), 64.0)    # Linear(64, 64).weight
    b2 = uniform(ks[3], (64,), 64.0)
    w3 = uniform(ks[4], (1, 64), 64.0)     # Linear(64, 1).weight
    b3 = uniform(ks[5], (1,), 64.0)

    # Block-diagonal layer-2 weight: `pack` copies of W2 fill the MXU.
    w2_big = jnp.zeros((pack * 64, pack * 64), jnp.float32)
    for p in range(pack):
        w2_big = w2_big.at[p * 64:(p + 1) * 64, p * 64:(p + 1) * 64].set(w2)

    tile_col = lambda v: jnp.tile(v.reshape(1, 64, 1), (pack, 1, 1))

    return {
        # kernel-side (stacked / block-diag / bf16 where it feeds the MXU)
        "w1_stack": tile_col(w1),                    # (pack, 64, 1) f32
        "b1_stack": tile_col(b1),                    # (pack, 64, 1) f32
        "w2_big_bf16": w2_big.astype(jnp.bfloat16),  # (pack*64, pack*64) bf16
        "b2_stack": tile_col(b2),                    # (pack, 64, 1) f32
        "w3_stack": tile_col(w3),                    # (pack, 64, 1) f32
        "b3": b3.reshape(1, 1),                      # (1, 1) f32 (SMEM)
        # full-precision copies for the references
        "w1": w1, "b1": b1, "w2": w2, "b2": b2, "w3": w3,
    }


def reference_forward_f32(x, p):
    """Pure-f32 JAX reference matching PyTorch SimpleNN semantics on (N,1) input."""
    h1 = jnp.maximum(x @ p["w1"].T + p["b1"][None, :], 0.0)     # (N, 64)
    h2 = jnp.maximum(h1 @ p["w2"].T + p["b2"][None, :], 0.0)    # (N, 64)
    return h2 @ p["w3"].T + p["b3"]                              # (N, 1)


def reference_forward_bf16(x, p):
    """Reference with the same bf16-input / f32-accumulate layer-2 matmul as the kernel."""
    h1 = jnp.maximum(x * p["w1"].T + p["b1"][None, :], 0.0)     # (N, 64) f32
    h2 = jnp.dot(h1.astype(jnp.bfloat16), p["w2"].astype(jnp.bfloat16).T,
                 preferred_element_type=jnp.float32) + p["b2"][None, :]
    h2 = jnp.maximum(h2, 0.0)
    return h2 @ p["w3"].T + p["b3"]                              # f32 layer 3, like the kernel


if __name__ == "__main__":
    key = jax.random.PRNGKey(0)
    k_x, k_p = jax.random.split(key)
    params = init_params(k_p, pack=4)   # pack=4 for v6e/v7x; use pack=2 on v5e

    # Small single-tile batch.
    batch = 8
    x = jax.random.normal(k_x, (batch, 1), dtype=jnp.float32)
    out = jax.block_until_ready(simple_nn_forward(x, params))
    assert out.shape == (batch, 1)
    assert jnp.allclose(out, reference_forward_bf16(x, params), atol=1e-4, rtol=1e-4), \
        "mismatch vs. bf16 reference"
    assert jnp.allclose(out, reference_forward_f32(x, params), atol=3e-2, rtol=3e-2), \
        "mismatch vs. f32 reference"

    # Multi-tile batch (exercises the multi-step parallel grid and tail padding).
    batch2 = 1000
    x2 = jax.random.normal(k_x, (batch2, 1), dtype=jnp.float32)
    out2 = jax.block_until_ready(simple_nn_forward(x2, params))
    assert out2.shape == (batch2, 1)
    assert jnp.allclose(out2, reference_forward_bf16(x2, params), atol=1e-4, rtol=1e-4), \
        "mismatch vs. bf16 reference (multi-tile)"

    print("KERNEL_OK")
</pallas_src>

<mosaic_0001>
module attributes {stable_mosaic.version = 11 : i64} {
  func.func @mlp_kernel(%arg0: i32, %arg1: memref<1x4x128xf32, #tpu.memory_space<vmem>>, %arg2: memref<4x64x1xf32, #tpu.memory_space<vmem>>, %arg3: memref<4x64x1xf32, #tpu.memory_space<vmem>>, %arg4: memref<256x256xbf16, #tpu.memory_space<vmem>>, %arg5: memref<4x64x1xf32, #tpu.memory_space<vmem>>, %arg6: memref<4x64x1xf32, #tpu.memory_space<vmem>>, %arg7: memref<1x1xf32, #tpu.memory_space<smem>>, %arg8: memref<1x4x128xf32, #tpu.memory_space<vmem>>) attributes {dimension_semantics = [#tpu.dimension_semantics<parallel>], iteration_bounds = array<i64: 1>, scalar_prefetch = 0 : i64, scratch_operands = 0 : i64, tpu.core_type = #tpu.core_type<tc>, window_params = [{transform_indices = @transform_0, window_bounds = array<i64: 1, 4, 128>}, {pipeline_mode = #tpu.pipeline_mode<synchronous>, transform_indices = @transform_1, window_bounds = array<i64: 4, 64, 1>}, {pipeline_mode = #tpu.pipeline_mode<synchronous>, transform_indices = @transform_2, window_bounds = array<i64: 4, 64, 1>}, {pipeline_mode = #tpu.pipeline_mode<synchronous>, transform_indices = @transform_3, window_bounds = array<i64: 256, 256>}, {pipeline_mode = #tpu.pipeline_mode<synchronous>, transform_indices = @transform_4, window_bounds = array<i64: 4, 64, 1>}, {pipeline_mode = #tpu.pipeline_mode<synchronous>, transform_indices = @transform_5, window_bounds = array<i64: 4, 64, 1>}, {transform_indices = @transform_6, window_bounds = array<i64: 1, 1>}, {transform_indices = @transform_7, window_bounds = array<i64: 1, 4, 128>}]} {
    %c0 = arith.constant 0 : index
    %c0_0 = arith.constant 0 : index
    %c0_1 = arith.constant 0 : index
    %0 = vector.load %arg1[%c0, %c0_0, %c0_1] : memref<1x4x128xf32, #tpu.memory_space<vmem>>, vector<1x4x128xf32>
    %1 = vector.shape_cast %0 : vector<1x4x128xf32> to vector<4x128xf32>
    %2 = vector.shape_cast %1 : vector<4x128xf32> to vector<4x1x128xf32>
    %c0_2 = arith.constant 0 : index
    %c0_3 = arith.constant 0 : index
    %c0_4 = arith.constant 0 : index
    %3 = vector.load %arg2[%c0_2, %c0_3, %c0_4] : memref<4x64x1xf32, #tpu.memory_space<vmem>>, vector<4x64x1xf32>
    %4 = vector.broadcast %2 : vector<4x1x128xf32> to vector<4x64x128xf32>
    %5 = vector.broadcast %3 : vector<4x64x1xf32> to vector<4x64x128xf32>
    %6 = arith.mulf %4, %5 : vector<4x64x128xf32>
    %c0_5 = arith.constant 0 : index
    %c0_6 = arith.constant 0 : index
    %c0_7 = arith.constant 0 : index
    %7 = vector.load %arg3[%c0_5, %c0_6, %c0_7] : memref<4x64x1xf32, #tpu.memory_space<vmem>>, vector<4x64x1xf32>
    %8 = vector.broadcast %7 : vector<4x64x1xf32> to vector<4x64x128xf32>
    %9 = arith.addf %6, %8 : vector<4x64x128xf32>
    %cst = arith.constant 0.000000e+00 : f32
    %10 = vector.broadcast %cst : f32 to vector<4x64x128xf32>
    %11 = arith.maximumf %9, %10 : vector<4x64x128xf32>
    %c0_8 = arith.constant 0 : index
    %c0_9 = arith.constant 0 : index
    %12 = vector.load %arg4[%c0_8, %c0_9] : memref<256x256xbf16, #tpu.memory_space<vmem>>, vector<256x256xbf16>
    %13 = arith.truncf %11 : vector<4x64x128xf32> to vector<4x64x128xbf16>
    %14 = vector.shape_cast %13 : vector<4x64x128xbf16> to vector<256x128xbf16>
    %cst_10 = arith.constant dense<0.000000e+00> : vector<256x128xf32>
    %15 = tpu.matmul %12, %14, %cst_10 {dimension_numbers = #tpu.dot_dimension_numbers<[1], [0], [0], [1], [0, 0, 1, 1], [], []>} : vector<256x256xbf16>, vector<256x128xbf16>, vector<256x128xf32> -> vector<256x128xf32>
    %16 = vector.shape_cast %15 : vector<256x128xf32> to vector<4x64x128xf32>
    %c0_11 = arith.constant 0 : index
    %c0_12 = arith.constant 0 : index
    %c0_13 = arith.constant 0 : index
    %17 = vector.load %arg5[%c0_11, %c0_12, %c0_13] : memref<4x64x1xf32, #tpu.memory_space<vmem>>, vector<4x64x1xf32>
    %18 = vector.broadcast %17 : vector<4x64x1xf32> to vector<4x64x128xf32>
    %19 = arith.addf %16, %18 : vector<4x64x128xf32>
    %cst_14 = arith.constant 0.000000e+00 : f32
    %20 = vector.broadcast %cst_14 : f32 to vector<4x64x128xf32>
    %21 = arith.maximumf %19, %20 : vector<4x64x128xf32>
    %c0_15 = arith.constant 0 : index
    %c0_16 = arith.constant 0 : index
    %c0_17 = arith.constant 0 : index
    %22 = vector.load %arg6[%c0_15, %c0_16, %c0_17] : memref<4x64x1xf32, #tpu.memory_space<vmem>>, vector<4x64x1xf32>
    %23 = vector.broadcast %22 : vector<4x64x1xf32> to vector<4x64x128xf32>
    %24 = arith.mulf %21, %23 : vector<4x64x128xf32>
    %cst_18 = arith.constant dense<0.000000e+00> : vector<4x128xf32>
    %25 = vector.multi_reduction <add>, %24, %cst_18 [1] : vector<4x64x128xf32> to vector<4x128xf32>
    %c0_19 = arith.constant 0 : index
    %c0_20 = arith.constant 0 : index
    %26 = memref.load %arg7[%c0_19, %c0_20] : memref<1x1xf32, #tpu.memory_space<smem>>
    %27 = vector.broadcast %26 : f32 to vector<4x128xf32>
    %28 = arith.addf %25, %27 : vector<4x128xf32>
    %c0_21 = arith.constant 0 : index
    %c0_22 = arith.constant 0 : index
    %c0_23 = arith.constant 0 : index
    %29 = vector.load %arg8[%c0_21, %c0_22, %c0_23] : memref<1x4x128xf32, #tpu.memory_space<vmem>>, vector<1x4x128xf32>
    %30 = vector.shape_cast %29 : vector<1x4x128xf32> to vector<4x128xf32>
    %31 = vector.shape_cast %28 : vector<4x128xf32> to vector<1x4x128xf32>
    tpu.vector_store %arg8[%c0_21, %c0_22, %c0_23], %31 {strides = array<i32>} : memref<1x4x128xf32, #tpu.memory_space<vmem>>, vector<1x4x128xf32>,
    return
  }
  func.func @transform_0(%arg0: i32) -> (i32, i32, i32) {
    %c0_i32 = arith.constant 0 : i32
    %c0_i32_0 = arith.constant 0 : i32
    %c0_i32_1 = arith.constant 0 : i32
    return %arg0, %c0_i32, %c0_i32_0 : i32, i32, i32
  }
  func.func @transform_1(%arg0: i32) -> (i32, i32, i32) {
    %c0_i32 = arith.constant 0 : i32
    %c0_i32_0 = arith.constant 0 : i32
    %c0_i32_1 = arith.constant 0 : i32
    %c0_i32_2 = arith.constant 0 : i32
    return %c0_i32, %c0_i32_0, %c0_i32_1 : i32, i32, i32
  }
  func.func @transform_2(%arg0: i32) -> (i32, i32, i32) {
    %c0_i32 = arith.constant 0 : i32
    %c0_i32_0 = arith.constant 0 : i32
    %c0_i32_1 = arith.constant 0 : i32
    %c0_i32_2 = arith.constant 0 : i32
    return %c0_i32, %c0_i32_0, %c0_i32_1 : i32, i32, i32
  }
  func.func @transform_3(%arg0: i32) -> (i32, i32) {
    %c0_i32 = arith.constant 0 : i32
    %c0_i32_0 = arith.constant 0 : i32
    %c0_i32_1 = arith.constant 0 : i32
    return %c0_i32, %c0_i32_0 : i32, i32
  }
  func.func @transform_4(%arg0: i32) -> (i32, i32, i32) {
    %c0_i32 = arith.constant 0 : i32
    %c0_i32_0 = arith.constant 0 : i32
    %c0_i32_1 = arith.constant 0 : i32
    %c0_i32_2 = arith.constant 0 : i32
    return %c0_i32, %c0_i32_0, %c0_i32_1 : i32, i32, i32
  }
  func.func @transform_5(%arg0: i32) -> (i32, i32, i32) {
    %c0_i32 = arith.constant 0 : i32
    %c0_i32_0 = arith.constant 0 : i32
    %c0_i32_1 = arith.constant 0 : i32
    %c0_i32_2 = arith.constant 0 : i32
    return %c0_i32, %c0_i32_0, %c0_i32_1 : i32, i32, i32
  }
  func.func @transform_6(%arg0: i32) -> (i32, i32) {
    %c0_i32 = arith.constant 0 : i32
    %c0_i32_0 = arith.constant 0 : i32
    %c0_i32_1 = arith.constant 0 : i32
    return %c0_i32, %c0_i32_0 : i32, i32
  }
  func.func @transform_7(%arg0: i32) -> (i32, i32, i32) {
    %c0_i32 = arith.constant 0 : i32
    %c0_i32_0 = arith.constant 0 : i32
    %c0_i32_1 = arith.constant 0 : i32
    return %arg0, %c0_i32, %c0_i32_0 : i32, i32, i32
  }
}

</mosaic_0001>

<bundles_post_ra>
// kernel: tpu_custom_call.1
= control target key start
LH: loop header
LB: loop body
LE: loop exit
PB: predicated region body
PF: predicated region fallthrough
CT: control target
= control target key end

     0   :  { %v1726_v2 = vmov 0   ;;  %s2558_s0 = inlined_call_operand.vmem [shape: f32[1,4,128], index: 0, kind: input, shape index: {}]   ;;  %s2559_s1 = inlined_call_operand.vmem [shape: f32[4,64,1], index: 1, kind: input, shape index: {}]   ;;  %s2560_s2 = inlined_call_operand.vmem [shape: f32[4,64,1], index: 2, kind: input, shape index: {}]   ;;  %s2561_s3 = inlined_call_operand.vmem [shape: bf16[256,256], index: 3, kind: input, shape index: {}]   ;;  %s2562_s4 = inlined_call_operand.vmem [shape: f32[4,64,1], index: 4, kind: input, shape index: {}]   ;;  %s2563_s5 = inlined_call_operand.vmem [shape: f32[4,64,1], index: 5, kind: input, shape index: {}]   ;;  %s2564_s6 = inlined_call_operand.<no memory space> [shape: f32[1,1], index: 6, kind: input, shape index: {}]   ;;  %s2565_s7 = inlined_call_operand.hbm [shape: f32[1,4,128], index: 7, kind: output, shape index: {}]  }
   0x1   :  { %v57_v0 = vld [vmem:[%s2559_s1 + $0x10] sm:$0xff]  ;;  %v55_v1 = vld [vmem:[%s2559_s1] sm:$0xff]  ;;  %1653 = vset.pattern.permute.xlu1 %v1726_v2  ;;  %1652 = vset.pattern.permute.xlu0 %v1726_v2  ;;  %v58_v3 = vld [vmem:[%s2559_s1 + $0x18] sm:$0xff] }
   0x2   :  { %119 = vperm.xlu1 %1653, %v57_v0   ;;  %109 = vperm.xlu0 %1652, %v55_v1   ;;  %v56_v4 = vld [vmem:[%s2559_s1 + $0x8] sm:$0xff]  ;;  %v59_v6 = vld [vmem:[%s2559_s1 + $0x20] sm:$0xff]  ;;  %v62_v7 = vld [vmem:[%s2559_s1 + $0x38] sm:$0xff] }
   0x3   :  { %v60_v5 = vld [vmem:[%s2559_s1 + $0x28] sm:$0xff]  ;;  %v61_v8 = vld [vmem:[%s2559_s1 + $0x30] sm:$0xff]  ;;  %v63_v10 = vld [vmem:[%s2559_s1 + $0x40] sm:$0xff] }
   0x4   :  { %v64_v9 = vld [vmem:[%s2559_s1 + $0x48] sm:$0xff]  ;;  %v66_v11 = vld [vmem:[%s2559_s1 + $0x58] sm:$0xff]  ;;  %v65_v12 = vld [vmem:[%s2559_s1 + $0x50] sm:$0xff] }
   0x5   :  { %v68_v13 = vld [vmem:[%s2559_s1 + $0x68] sm:$0xff]  ;;  %v67_v14 = vld [vmem:[%s2559_s1 + $0x60] sm:$0xff]  ;;  %v70_v15 = vld [vmem:[%s2559_s1 + $0x78] sm:$0xff] }
   0x6   :  { %124 = vperm.xlu1 %1653, %v58_v3   ;;  %114 = vperm.xlu0 %1652, %v56_v4   ;;  %v69_v16 = vld [vmem:[%s2559_s1 + $0x70] sm:$0xff]  ;;  %v72_v17 = vld [vmem:[%s2559_s1 + $0x88] sm:$0xff]  ;;  %v71_v18 = vld [vmem:[%s2559_s1 + $0x80] sm:$0xff] }
   0x7   :  { %v74_v19 = vld [vmem:[%s2559_s1 + $0x98] sm:$0xff]  ;;  %v73_v20 = vld [vmem:[%s2559_s1 + $0x90] sm:$0xff]  ;;  %v76_v21 = vld [vmem:[%s2559_s1 + $0xa8] sm:$0xff] }
   0x8   :  { %v75_v22 = vld [vmem:[%s2559_s1 + $0xa0] sm:$0xff] }
   0xa   :  { %134 = vperm.xlu1 %1653, %v60_v5   ;;  %129 = vperm.xlu0 %1652, %v59_v6  }
   0xe   :  { %144 = vperm.xlu1 %1653, %v62_v7   ;;  %139 = vperm.xlu0 %1652, %v61_v8  }
  0x12   :  { %154 = vperm.xlu1 %1653, %v64_v9   ;;  %149 = vperm.xlu0 %1652, %v63_v10  }
  0x16   :  { %164 = vperm.xlu1 %1653, %v66_v11   ;;  %159 = vperm.xlu0 %1652, %v65_v12  }
  0x1a   :  { %174 = vperm.xlu1 %1653, %v68_v13   ;;  %169 = vperm.xlu0 %1652, %v67_v14  }
  0x1e   :  { %184 = vperm.xlu1 %1653, %v70_v15   ;;  %179 = vperm.xlu0 %1652, %v69_v16  }
  0x22   :  { %194 = vperm.xlu1 %1653, %v72_v17   ;;  %189 = vperm.xlu0 %1652, %v71_v18  }
  0x26   :  { %204 = vperm.xlu1 %1653, %v74_v19   ;;  %199 = vperm.xlu0 %1652, %v73_v20  }
  0x27   :  { %13 = vsyncpa [#allocation4], 0  ;;  %v78_v23 = vld [vmem:[%s2559_s1 + $0xb8] sm:$0xff]  ;;  %v77_v24 = vld [vmem:[%s2559_s1 + $0xb0] sm:$0xff]  ;;  %vm1466_vm0 = vcmask 1041409   ;;  %vm1468_vm1 = vcmask 1042434  }
  0x28   :  { %v80_v25 = vld [vmem:[%s2559_s1 + $0xc8] sm:$0xff]  ;;  %v79_v26 = vld [vmem:[%s2559_s1 + $0xc0] sm:$0xff]  ;;  %v82_v27 = vld [vmem:[%s2559_s1 + $0xd8] sm:$0xff]  ;;  %vm1470_vm2 = vcmask 1043459  }
  0x29   :  { %v81_v28 = vld [vmem:[%s2559_s1 + $0xd0] sm:$0xff]  ;;  %v316_v29 = vld [vmem:[%s2560_s2 + $0x88] sm:$0xff]  ;;  %v315_v30 = vld [vmem:[%s2560_s2 + $0x80] sm:$0xff] }
  0x2a   :  { %214 = vperm.xlu1 %1653, %v76_v21   ;;  %209 = vperm.xlu0 %1652, %v75_v22   ;;  %v300_v31 = vld [vmem:[%s2560_s2 + $0x8] sm:$0xff]  ;;  %v299_v32 = vld [vmem:[%s2560_s2] sm:$0xff]  ;;  %v318_v33 = vld [vmem:[%s2560_s2 + $0x98] sm:$0xff] }
  0x2b   :  { %v317_v34 = vld [vmem:[%s2560_s2 + $0x90] sm:$0xff]  ;;  %v302_v35 = vld [vmem:[%s2560_s2 + $0x18] sm:$0xff]  ;;  %v320_v37 = vld [vmem:[%s2560_s2 + $0xa8] sm:$0xff] }
  0x2c   :  { %v301_v36 = vld [vmem:[%s2560_s2 + $0x10] sm:$0xff]  ;;  %v319_v38 = vld [vmem:[%s2560_s2 + $0xa0] sm:$0xff]  ;;  %v304_v39 = vld [vmem:[%s2560_s2 + $0x28] sm:$0xff] }
  0x2d   :  { %v303_v40 = vld [vmem:[%s2560_s2 + $0x20] sm:$0xff]  ;;  %v322_v41 = vld [vmem:[%s2560_s2 + $0xb8] sm:$0xff]  ;;  %v321_v42 = vld [vmem:[%s2560_s2 + $0xb0] sm:$0xff] }
  0x2e   :  { %224 = vperm.xlu1 %1653, %v78_v23   ;;  %219 = vperm.xlu0 %1652, %v77_v24   ;;  %v306_v43 = vld [vmem:[%s2560_s2 + $0x38] sm:$0xff]  ;;  %v305_v44 = vld [vmem:[%s2560_s2 + $0x30] sm:$0xff]  ;;  %v324_v45 = vld [vmem:[%s2560_s2 + $0xc8] sm:$0xff] }
  0x2f   :  { %v323_v46 = vld [vmem:[%s2560_s2 + $0xc0] sm:$0xff]  ;;  %v308_v47 = vld [vmem:[%s2560_s2 + $0x48] sm:$0xff]  ;;  %v326_v49 = vld [vmem:[%s2560_s2 + $0xd8] sm:$0xff] }
  0x30   :  { %v307_v48 = vld [vmem:[%s2560_s2 + $0x40] sm:$0xff]  ;;  %v325_v50 = vld [vmem:[%s2560_s2 + $0xd0] sm:$0xff]  ;;  %v310_v51 = vld [vmem:[%s2560_s2 + $0x58] sm:$0xff] }
  0x31   :  { %v309_v52 = vld [vmem:[%s2560_s2 + $0x50] sm:$0xff]  ;;  %v84_v53 = vld [vmem:[%s2559_s1 + $0xe8] sm:$0xff]  ;;  %v83_v54 = vld [vmem:[%s2559_s1 + $0xe0] sm:$0xff] }
  0x32   :  { %234 = vperm.xlu1 %1653, %v80_v25   ;;  %229 = vperm.xlu0 %1652, %v79_v26   ;;  %v328_v55 = vld [vmem:[%s2560_s2 + $0xe8] sm:$0xff]  ;;  %v327_v56 = vld [vmem:[%s2560_s2 + $0xe0] sm:$0xff]  ;;  %v86_v59 = vld [vmem:[%s2559_s1 + $0xf8] sm:$0xff] }
  0x33   :  { %v312_v57 = vld [vmem:[%s2560_s2 + $0x68] sm:$0xff]  ;;  %v311_v58 = vld [vmem:[%s2560_s2 + $0x60] sm:$0xff]  ;;  %v85_v60 = vld [vmem:[%s2559_s1 + $0xf0] sm:$0xff] }
  0x34   :  { %v330_v61 = vld [vmem:[%s2560_s2 + $0xf8] sm:$0xff]  ;;  %v329_v62 = vld [vmem:[%s2560_s2 + $0xf0] sm:$0xff]  ;;  %v925_v1 = vld [vmem:[%s2562_s4 + $0x8] sm:$0xff] }
  0x35   :  { %v314_v63 = vld [vmem:[%s2560_s2 + $0x78] sm:$0xff]  ;;  %v313_v0 = vld [vmem:[%s2560_s2 + $0x70] sm:$0xff]  ;;  %v924_v2 = vld [vmem:[%s2562_s4] sm:$0xff]  ;;  %s1728_s2 = smov [#allocation3]  }
  0x36   :  { %244 = vperm.xlu1 %1653, %v82_v27   ;;  %239 = vperm.xlu0 %1652, %v81_v28   ;;  %v927_v5 = vld [vmem:[%s2562_s4 + $0x18] sm:$0xff]  ;;  %v926_v6 = vld [vmem:[%s2562_s4 + $0x10] sm:$0xff]  ;;  %v1656_v7 = vld [vmem:[%s2561_s3 + $0x4] ss:$8 sps:$4 sm:$0xff]   ;;  %s1480_s19 = sshll.u32 %s1728_s2, 4  ;;  %s1481_s19 = int_to_ptr.vmem [resolvable:$true] %s1480_s19 }
  0x37   :  { %v1659_v8 = vld [vmem:[%s2561_s3 + $0x84] ss:$8 sps:$4 sm:$0xff]   ;;  %795 = vmatprep.mubr.bf16.mxu0 %v1656_v7  ;;  %v931_v15 = vld [vmem:[%s2562_s4 + $0x38] sm:$0xff]  ;;  %v930_v16 = vld [vmem:[%s2562_s4 + $0x30] sm:$0xff]  ;;  %s1702_s20 = scalar_lea.vmem %s1481_s19, 64  ;;  %p1707_p1 = scmp.lt.s32.totalorder %s1481_s19, %s1481_s19 }
  0x38   :  { %v929_v11 = vld [vmem:[%s2562_s4 + $0x28] sm:$0xff]  ;;  %v928_v12 = vld [vmem:[%s2562_s4 + $0x20] sm:$0xff]  ;;  %859 = vmatprep.mubr.bf16.mxu1 %v1659_v8  ;;  %v935_v23 = vld [vmem:[%s2562_s4 + $0x58] sm:$0xff]  ;;  %p1703_p0 = scmp.ne.s32.totalorder %s1481_s19, %s1702_s20  ;;  %p1708_p2 = scmp.lt.s32.totalorder %s1702_s20, %s1702_s20 }
  0x39   :  { %v933_v19 = vld [vmem:[%s2562_s4 + $0x48] sm:$0xff]  ;;  %v932_v20 = vld [vmem:[%s2562_s4 + $0x40] sm:$0xff]  ;;  %v934_v24 = vld [vmem:[%s2562_s4 + $0x50] sm:$0xff] }
  0x3a   :  { %418 = vperm.xlu1 %1653, %v316_v29   ;;  %413 = vperm.xlu0 %1652, %v315_v30   ;;  %v937_v27 = vld [vmem:[%s2562_s4 + $0x68] sm:$0xff]  ;;  %v936_v28 = vld [vmem:[%s2562_s4 + $0x60] sm:$0xff]  ;;  %p1709_p3 = por %p1708_p2, %p1707_p1 }
  0x3b   :  { %v953_v8 = vld [vmem:[%s2562_s4 + $0xe8] sm:$0xff] }
  0x3c   :  { %p1710_p4 = pnand %p1709_p3, %p1703_p0 }
  0x3e   :  { %338 = vperm.xlu1 %1653, %v300_v31   ;;  %333 = vperm.xlu0 %1652, %v299_v32   ;;  %v939_v31 = vld [vmem:[%s2562_s4 + $0x78] sm:$0xff]  ;;  %v938_v32 = vld [vmem:[%s2562_s4 + $0x70] sm:$0xff] }
  0x42   :  { %428 = vperm.xlu1 %1653, %v318_v33   ;;  %423 = vperm.xlu0 %1652, %v317_v34  }
  0x46   :  { %348 = vperm.xlu1 %1653, %v302_v35   ;;  %343 = vperm.xlu0 %1652, %v301_v36   ;;  %v941_v35 = vld [vmem:[%s2562_s4 + $0x88] sm:$0xff]  ;;  %v940_v36 = vld [vmem:[%s2562_s4 + $0x80] sm:$0xff] }
  0x4a   :  { %438 = vperm.xlu1 %1653, %v320_v37   ;;  %433 = vperm.xlu0 %1652, %v319_v38  }
  0x4e   :  { %358 = vperm.xlu1 %1653, %v304_v39   ;;  %353 = vperm.xlu0 %1652, %v303_v40   ;;  %v1727_v39 = vmov 1966171168  }
  0x4f   :  { %v40_v40 = vunpack.c.l.s4 %v1727_v39 }
  0x52   :  { %448 = vperm.xlu1 %1653, %v322_v41   ;;  %443 = vperm.xlu0 %1652, %v321_v42   ;;  %v42_v41 = vlaneseq  ;;  %v943_v42 = vld [vmem:[%s2562_s4 + $0x98] sm:$0xff] }
  0x56   :  { %368 = vperm.xlu1 %1653, %v306_v43   ;;  %363 = vperm.xlu0 %1652, %v305_v44   ;;  %v942_v43 = vld [vmem:[%s2562_s4 + $0x90] sm:$0xff] }
  0x5a   :  { %458 = vperm.xlu1 %1653, %v324_v45   ;;  %453 = vperm.xlu0 %1652, %v323_v46   ;;  %v41_v46 = vunpack.c.0.s8 %v40_v40 }
  0x5e   :  { %378 = vperm.xlu1 %1653, %v308_v47   ;;  %373 = vperm.xlu0 %1652, %v307_v48   ;;  %v43_v47 = vshrl.u32 %v42_v41, 7  ;;  %v945_v48 = vld [vmem:[%s2562_s4 + $0xa8] sm:$0xff] }
  0x62   :  { %468 = vperm.xlu1 %1653, %v326_v49   ;;  %463 = vperm.xlu0 %1652, %v325_v50   ;;  %v944_v49 = vld [vmem:[%s2562_s4 + $0xa0] sm:$0xff] }
  0x66   :  { %388 = vperm.xlu1 %1653, %v310_v51   ;;  %383 = vperm.xlu0 %1652, %v309_v52   ;;  %v2069_v52 = vsub.s32 %v41_v46, %v43_v47 }
  0x6a   :  { %254 = vperm.xlu1 %1653, %v84_v53   ;;  %249 = vperm.xlu0 %1652, %v83_v54   ;;  %v2074_v53 = vld.sshfl [vmem:[%s2558_s0] sm:$0x33 pattern:$0x75316420]  ;;  %v947_v54 = vld [vmem:[%s2562_s4 + $0xb8] sm:$0xff] }
  0x6e   :  { %478 = vperm.xlu1 %1653, %v328_v55   ;;  %473 = vperm.xlu0 %1652, %v327_v56   ;;  %v946_v55 = vld [vmem:[%s2562_s4 + $0xb0] sm:$0xff] }
  0x72   :  { %398 = vperm.xlu1 %1653, %v312_v57   ;;  %393 = vperm.xlu0 %1652, %v311_v58   ;;  %v45_v58 = vrot.slane %v2074_v53, %v2069_v52 }
  0x76   :  { %264 = vperm.xlu1 %1653, %v86_v59   ;;  %259 = vperm.xlu0 %1652, %v85_v60   ;;  %v949_v59 = vld [vmem:[%s2562_s4 + $0xc8] sm:$0xff]  ;;  %v948_v60 = vld [vmem:[%s2562_s4 + $0xc0] sm:$0xff] }
  0x7a   :  { %488 = vperm.xlu1 %1653, %v330_v61   ;;  %483 = vperm.xlu0 %1652, %v329_v62   ;;  %v53_v61 = vcombine.high %v45_v58, %v45_v58 }
  0x7e   :  { %408 = vperm.xlu1 %1653, %v314_v63   ;;  %403 = vperm.xlu0 %1652, %v313_v0   ;;  %v2098_v0 = vsub.s32 0, %v43_v47 }
  0x81   :  { %v1967_v3 = vpop.permute.xlu1 %119  ;;  %v1969_v4 = vpop.permute.xlu0 %109 }
  0x82   :  { %963 = vperm.xlu1 %1653, %v925_v1   ;;  %958 = vperm.xlu0 %1652, %v924_v2   ;;  %v951_v1 = vld [vmem:[%s2562_s4 + $0xd8] sm:$0xff]  ;;  %v950_v2 = vld [vmem:[%s2562_s4 + $0xd0] sm:$0xff] }
  0x85   :  { %v1983_v9 = vpop.permute.xlu1 %124  ;;  %v1985_v10 = vpop.permute.xlu0 %114 }
  0x86   :  { %973 = vperm.xlu1 %1653, %v927_v5   ;;  %968 = vperm.xlu0 %1652, %v926_v6   ;;  %v2107_v5 = vrot.slane %v53_v61, %v2098_v0 }
  0x89   :  { %v1993_v13 = vpop.permute.xlu1 %134  ;;  %v1995_v14 = vpop.permute.xlu0 %129 }
  0x8a   :  { %983 = vperm.xlu1 %1653, %v929_v11   ;;  %978 = vperm.xlu0 %1652, %v928_v12   ;;  %v952_v11 = vld [vmem:[%s2562_s4 + $0xe0] sm:$0xff]  ;;  %v2120_v12 = vrot.slane %v45_v58, %v2098_v0 }
  0x8d   :  { %v2003_v17 = vpop.permute.xlu1 %144  ;;  %v2005_v18 = vpop.permute.xlu0 %139 }
  0x8e   :  { %993 = vperm.xlu1 %1653, %v931_v15   ;;  %988 = vperm.xlu0 %1652, %v930_v16  }
  0x91   :  { %v2013_v21 = vpop.permute.xlu1 %154  ;;  %v2015_v22 = vpop.permute.xlu0 %149 }
  0x92   :  { %1003 = vperm.xlu1 %1653, %v933_v19   ;;  %998 = vperm.xlu0 %1652, %v932_v20  }
  0x95   :  { %v2023_v25 = vpop.permute.xlu1 %164  ;;  %v2025_v26 = vpop.permute.xlu0 %159 }
  0x96   :  { %1013 = vperm.xlu1 %1653, %v935_v23   ;;  %1008 = vperm.xlu0 %1652, %v934_v24  }
  0x99   :  { %v2033_v29 = vpop.permute.xlu1 %174  ;;  %v2035_v30 = vpop.permute.xlu0 %169 }
  0x9a   :  { %1023 = vperm.xlu1 %1653, %v937_v27   ;;  %1018 = vperm.xlu0 %1652, %v936_v28   ;;  %v955_v27 = vld [vmem:[%s2562_s4 + $0xf8] sm:$0xff]  ;;  %v954_v28 = vld [vmem:[%s2562_s4 + $0xf0] sm:$0xff] }
  0x9d   :  { %v2043_v33 = vpop.permute.xlu1 %184  ;;  %v2045_v34 = vpop.permute.xlu0 %179 }
  0x9e   :  { %1033 = vperm.xlu1 %1653, %v939_v31   ;;  %1028 = vperm.xlu0 %1652, %v938_v32   ;;  %v267_v31 = vmul.f32 %v1969_v4, %v2120_v12  ;;  %v268_v32 = vmul.f32 %v1985_v10, %v2120_v12  ;;  %v1180_v4 = vld [vmem:[%s2563_s5] sm:$0xff] }
  0xa1   :  { %v195_v37 = vpop.permute.xlu1 %194  ;;  %v190_v38 = vpop.permute.xlu0 %189 }
  0xa2   :  { %1043 = vperm.xlu1 %1653, %v941_v35   ;;  %1038 = vperm.xlu0 %1652, %v940_v36   ;;  %v284_v15 = vmul.f32 %v195_v37, %v2107_v5  ;;  %v283_v16 = vmul.f32 %v190_v38, %v2107_v5 }
  0xa5   :  { %v205_v44 = vpop.permute.xlu1 %204  ;;  %v200_v45 = vpop.permute.xlu0 %199 }
  0xa6   :  { %1053 = vperm.xlu1 %1653, %v943_v42   ;;  %1048 = vperm.xlu0 %1652, %v942_v43   ;;  %v1181_v42 = vld [vmem:[%s2563_s5 + $0x8] sm:$0xff]  ;;  %v286_v43 = vmul.f32 %v205_v44, %v2107_v5  ;;  %v285_v10 = vmul.f32 %v200_v45, %v2107_v5  ;;  %v1182_v44 = vld [vmem:[%s2563_s5 + $0x10] sm:$0xff]  ;;  %v269_v45 = vmul.f32 %v1967_v3, %v2120_v12  ;;  %v1184_v3 = vld [vmem:[%s2563_s5 + $0x20] sm:$0xff] }
  0xa9   :  { %v2065_v50 = vpop.permute.xlu1 %214  ;;  %v2067_v51 = vpop.permute.xlu0 %209 }
  0xaa   :  { %1063 = vperm.xlu1 %1653, %v945_v48   ;;  %1058 = vperm.xlu0 %1652, %v944_v49  }
  0xad   :  { %v2082_v56 = vpop.permute.xlu1 %224  ;;  %v2084_v57 = vpop.permute.xlu0 %219 }
  0xae   :  { %1073 = vperm.xlu1 %1653, %v947_v54   ;;  %1068 = vperm.xlu0 %1652, %v946_v55  }
  0xb1   :  { %v2094_v62 = vpop.permute.xlu1 %234  ;;  %v2096_v63 = vpop.permute.xlu0 %229 }
  0xb2   :  { %1083 = vperm.xlu1 %1653, %v949_v59   ;;  %1078 = vperm.xlu0 %1652, %v948_v60   ;;  %v1183_v59 = vld [vmem:[%s2563_s5 + $0x18] sm:$0xff]  ;;  %v270_v60 = vmul.f32 %v1983_v9, %v2120_v12  ;;  %v288_v9 = vmul.f32 %v2065_v50, %v2107_v5 }
  0xb3   :  { %v1187_v50 = vld [vmem:[%s2563_s5 + $0x38] sm:$0xff] }
  0xb5   :  { %v2109_v6 = vpop.permute.xlu1 %244  ;;  %v2111_v7 = vpop.permute.xlu0 %239 }
  0xb6   :  { %1093 = vperm.xlu1 %1653, %v951_v1   ;;  %1088 = vperm.xlu0 %1652, %v950_v2  }
  0xb9   :  { %v419_v19 = vpop.permute.xlu1 %418  ;;  %v414_v20 = vpop.permute.xlu0 %413 }
  0xba   :  { %v508_v23 = vadd.f32 %v419_v19, %v284_v15  ;;  %v507_v24 = vadd.f32 %v414_v20, %v283_v16  ;;  %1103 = vperm.xlu1 %1653, %v953_v8   ;;  %1098 = vperm.xlu0 %1652, %v952_v11   ;;  %v1185_v19 = vld [vmem:[%s2563_s5 + $0x28] sm:$0xff]  ;;  %v287_v20 = vmul.f32 %v2067_v51, %v2107_v5  ;;  %v1186_v51 = vld [vmem:[%s2563_s5 + $0x30] sm:$0xff] }
  0xbc   :  { %v540_v35 = vmax.f32 %v508_v23, 0.0  ;;  %v539_v36 = vmax.f32 %v507_v24, 0.0 }
  0xbd   :  { %v339_v37 = vpop.permute.xlu1 %338  ;;  %v334_v38 = vpop.permute.xlu0 %333 }
  0xbe   :  { %v492_v39 = vadd.f32 %v339_v37, %v268_v32  ;;  %v491_v40 = vadd.f32 %v334_v38, %v267_v31  ;;  %1113 = vperm.xlu1 %1653, %v955_v27   ;;  %1108 = vperm.xlu0 %1652, %v954_v28   ;;  %v595_v41 = vpack.c.bf16 %v540_v35, %v539_v36 }
  0xbf   :  { %v38_v27 = vcombine.high %v2074_v53, %v2074_v53  ;;  %v272_v37 = vmul.f32 %v1993_v13, %v2120_v12  ;;  %v271_v53 = vmul.f32 %v1995_v14, %v2120_v12  ;;  %v1189_v13 = vld [vmem:[%s2563_s5 + $0x48] sm:$0xff]  ;;  %v1188_v14 = vld [vmem:[%s2563_s5 + $0x40] sm:$0xff] }
  0xc0   :  { %v524_v46 = vmax.f32 %v492_v39, 0.0  ;;  %v523_v47 = vmax.f32 %v491_v40, 0.0  ;;  %1521 = vmatprep.subr.bf16.mxu0 %v595_v41  ;;  %1633 = vmatprep.subr.bf16.mxu1 %v595_v41 }
  0xc1   :  { %v429_v48 = vpop.permute.xlu1 %428  ;;  %v424_v49 = vpop.permute.xlu0 %423  ;;  %v52_v40 = vrot.slane %v38_v27, %v2069_v52  ;;  %v289_v52 = vmul.f32 %v2084_v57, %v2107_v5  ;;  %v1196_v57 = vld [vmem:[%s2563_s5 + $0x80] sm:$0xff] }
  0xc2   :  { %v510_v54 = vadd.f32 %v429_v48, %v286_v43  ;;  %v509_v55 = vadd.f32 %v424_v49, %v285_v10  ;;  %1219 = vperm.xlu1 %1653, %v1181_v42   ;;  %1214 = vperm.xlu0 %1652, %v1180_v4   ;;  %v587_v58 = vpack.c.bf16 %v524_v46, %v523_v47 }
  0xc3   :  { %v54_v46 = vcombine.high %v52_v40, %v52_v40  ;;  %v290_v47 = vmul.f32 %v2082_v56, %v2107_v5  ;;  %v1197_v56 = vld [vmem:[%s2563_s5 + $0x88] sm:$0xff]  ;;  %v274_v5 = vmul.f32 %v2003_v17, %v2120_v12  ;;  %v1204_v17 = vld [vmem:[%s2563_s5 + $0xc0] sm:$0xff] }
  0xc4   :  { %v542_v61 = vmax.f32 %v510_v54, 0.0  ;;  %v541_v1 = vmax.f32 %v509_v55, 0.0  ;;  %1522 = vmatpush3.bf16.msra.mxu0 %v587_v58  ;;  %1641 = vmatpush3.bf16.msra.mxu1 %v587_v58 }
  0xc5   :  { %v349_v2 = vpop.permute.xlu1 %348  ;;  %v344_v8 = vpop.permute.xlu0 %343 }
  0xc6   :  { %v596_v11 = vpack.c.bf16 %v542_v61, %v541_v1  ;;  %v494_v15 = vadd.f32 %v349_v2, %v270_v60  ;;  %v493_v16 = vadd.f32 %v344_v8, %v269_v45  ;;  %1229 = vperm.xlu1 %1653, %v1183_v59   ;;  %1224 = vperm.xlu0 %1652, %v1182_v44  }
  0xc7   :  { %v2186_v45 = vrot.slane %v54_v46, %v2098_v0  ;;  %v273_v60 = vmul.f32 %v2005_v18, %v2120_v12  ;;  %v1190_v18 = vld [vmem:[%s2563_s5 + $0x50] sm:$0xff] }
  0xc8   :  { %v526_v23 = vmax.f32 %v494_v15, 0.0  ;;  %v525_v24 = vmax.f32 %v493_v16, 0.0  ;;  %1523 = vmatprep.subr.bf16.mxu0 %v596_v11  ;;  %1634 = vmatprep.subr.bf16.mxu1 %v596_v11 }
  0xc9   :  { %v439_v28 = vpop.permute.xlu1 %438  ;;  %v434_v31 = vpop.permute.xlu0 %433  ;;  %v292_v12 = vmul.f32 %v2094_v62, %v2186_v45  ;;  %v1205_v62 = vld [vmem:[%s2563_s5 + $0xc8] sm:$0xff] }
  0xca   :  { %v588_v32 = vpack.c.bf16 %v526_v23, %v525_v24  ;;  %v512_v35 = vadd.f32 %v439_v28, %v288_v9  ;;  %v511_v36 = vadd.f32 %v434_v31, %v287_v20  ;;  %1239 = vperm.xlu1 %1653, %v1185_v19   ;;  %1234 = vperm.xlu0 %1652, %v1184_v3   ;;  %v1198_v31 = vld [vmem:[%s2563_s5 + $0x90] sm:$0xff] }
  0xcb   :  { %v2199_v19 = vrot.slane %v52_v40, %v2098_v0  ;;  %v291_v3 = vmul.f32 %v2096_v63, %v2186_v45  ;;  %v293_v40 = vmul.f32 %v2111_v7, %v2186_v45 }
  0xcc   :  { %v544_v38 = vmax.f32 %v512_v35, 0.0  ;;  %v543_v39 = vmax.f32 %v511_v36, 0.0  ;;  %1524 = vmatpush3.bf16.msra.mxu0 %v588_v32  ;;  %1642 = vmatpush3.bf16.msra.mxu1 %v588_v32 }
  0xcd   :  { %v359_v41 = vpop.permute.xlu1 %358  ;;  %v354_v42 = vpop.permute.xlu0 %353  ;;  %v276_v63 = vmul.f32 %v2013_v21, %v2199_v19  ;;  %v275_v32 = vmul.f32 %v2015_v22, %v2199_v19  ;;  %v1191_v21 = vld [vmem:[%s2563_s5 + $0x58] sm:$0xff]  ;;  %v294_v22 = vmul.f32 %v2109_v6, %v2186_v45  ;;  %v278_v7 = vmul.f32 %v2023_v25, %v2199_v19 }
  0xce   :  { %v597_v4 = vpack.c.bf16 %v544_v38, %v543_v39  ;;  %v496_v43 = vadd.f32 %v359_v41, %v272_v37  ;;  %v495_v10 = vadd.f32 %v354_v42, %v271_v53  ;;  %1249 = vperm.xlu1 %1653, %v1187_v50   ;;  %1244 = vperm.xlu0 %1652, %v1186_v51   ;;  %v1206_v39 = vld [vmem:[%s2563_s5 + $0xd0] sm:$0xff]  ;;  %v1199_v6 = vld [vmem:[%s2563_s5 + $0x98] sm:$0xff] }
  0xcf   :  { %v1207_v25 = vld [vmem:[%s2563_s5 + $0xd8] sm:$0xff] }
  0xd0   :  { %v528_v48 = vmax.f32 %v496_v43, 0.0  ;;  %v527_v49 = vmax.f32 %v495_v10, 0.0  ;;  %1525 = vmatprep.subr.bf16.mxu0 %v597_v4  ;;  %1635 = vmatprep.subr.bf16.mxu1 %v597_v4 }
  0xd1   :  { %v449_v54 = vpop.permute.xlu1 %448  ;;  %v444_v55 = vpop.permute.xlu0 %443 }
  0xd2   :  { %v589_v58 = vpack.c.bf16 %v528_v48, %v527_v49  ;;  %v514_v59 = vadd.f32 %v449_v54, %v290_v47  ;;  %v513_v44 = vadd.f32 %v444_v55, %v289_v52  ;;  %1259 = vperm.xlu1 %1653, %v1189_v13   ;;  %1254 = vperm.xlu0 %1652, %v1188_v14   ;;  %v1192_v14 = vld [vmem:[%s2563_s5 + $0x60] sm:$0xff] }
  0xd3   :  { %v277_v47 = vmul.f32 %v2025_v26, %v2199_v19 }
  0xd4   :  { %v546_v61 = vmax.f32 %v514_v59, 0.0  ;;  %v545_v1 = vmax.f32 %v513_v44, 0.0  ;;  %1526 = vmatpush3.bf16.msra.mxu0 %v589_v58  ;;  %1643 = vmatpush3.bf16.msra.mxu1 %v589_v58  ;;  %v1200_v44 = vld [vmem:[%s2563_s5 + $0xa0] sm:$0xff] }
  0xd5   :  { %v369_v2 = vpop.permute.xlu1 %368  ;;  %v364_v8 = vpop.permute.xlu0 %363 }
  0xd6   :  { %v598_v11 = vpack.c.bf16 %v546_v61, %v545_v1  ;;  %v498_v15 = vadd.f32 %v369_v2, %v274_v5  ;;  %v497_v16 = vadd.f32 %v364_v8, %v273_v60  ;;  %1299 = vperm.xlu1 %1653, %v1197_v56   ;;  %1294 = vperm.xlu0 %1652, %v1196_v57   ;;  %v1208_v61 = vld [vmem:[%s2563_s5 + $0xe0] sm:$0xff]  ;;  %v1193_v1 = vld [vmem:[%s2563_s5 + $0x68] sm:$0xff] }
  0xd8   :  { %v530_v9 = vmax.f32 %v498_v15, 0.0  ;;  %v529_v20 = vmax.f32 %v497_v16, 0.0  ;;  %1527 = vmatprep.subr.bf16.mxu0 %v598_v11  ;;  %1636 = vmatprep.subr.bf16.mxu1 %v598_v11 }
  0xd9   :  { %v459_v0 = vpop.permute.xlu1 %458  ;;  %v454_v23 = vpop.permute.xlu0 %453 }
  0xda   :  { %v590_v24 = vpack.c.bf16 %v530_v9, %v529_v20  ;;  %v516_v27 = vadd.f32 %v459_v0, %v292_v12  ;;  %v515_v28 = vadd.f32 %v454_v23, %v291_v3  ;;  %1334 = vperm.xlu1 %1653, %v1204_v17   ;;  %1264 = vperm.xlu0 %1652, %v1190_v18   ;;  %v1194_v18 = vld [vmem:[%s2563_s5 + $0x70] sm:$0xff]  ;;  %v1201_v12 = vld [vmem:[%s2563_s5 + $0xa8] sm:$0xff] }
  0xdb   :  { %v280_v3 = vmul.f32 %v2033_v29, %v2199_v19  ;;  %v279_v9 = vmul.f32 %v2035_v30, %v2199_v19  ;;  %v1209_v29 = vld [vmem:[%s2563_s5 + $0xe8] sm:$0xff] }
  0xdc   :  { %v548_v35 = vmax.f32 %v516_v27, 0.0  ;;  %v547_v36 = vmax.f32 %v515_v28, 0.0  ;;  %1528 = vmatpush3.bf16.msra.mxu0 %v590_v24  ;;  %1644 = vmatpush3.bf16.msra.mxu1 %v590_v24 }
  0xdd   :  { %v379_v50 = vpop.permute.xlu1 %378  ;;  %v374_v51 = vpop.permute.xlu0 %373 }
  0xde   :  { %v599_v37 = vpack.c.bf16 %v548_v35, %v547_v36  ;;  %v500_v53 = vadd.f32 %v379_v50, %v276_v63  ;;  %v499_v38 = vadd.f32 %v374_v51, %v275_v32  ;;  %1304 = vperm.xlu1 %1653, %v1198_v31   ;;  %1339 = vperm.xlu0 %1652, %v1205_v62   ;;  %v1202_v62 = vld [vmem:[%s2563_s5 + $0xb0] sm:$0xff]  ;;  %v1195_v51 = vld [vmem:[%s2563_s5 + $0x78] sm:$0xff] }
  0xdf   :  { %v1210_v50 = vld [vmem:[%s2563_s5 + $0xf0] sm:$0xff] }
  0xe0   :  { %v532_v41 = vmax.f32 %v500_v53, 0.0  ;;  %v531_v42 = vmax.f32 %v499_v38, 0.0  ;;  %1529 = vmatprep.subr.bf16.mxu0 %v599_v37  ;;  %1637 = vmatprep.subr.bf16.mxu1 %v599_v37 }
  0xe1   :  { %v469_v4 = vpop.permute.xlu1 %468  ;;  %v464_v43 = vpop.permute.xlu0 %463 }
  0xe2   :  { %v591_v10 = vpack.c.bf16 %v532_v41, %v531_v42  ;;  %v518_v46 = vadd.f32 %v469_v4, %v294_v22  ;;  %v517_v13 = vadd.f32 %v464_v43, %v293_v40  ;;  %1344 = vperm.xlu1 %1653, %v1206_v39   ;;  %1269 = vperm.xlu0 %1652, %v1191_v21   ;;  %v1211_v40 = vld [vmem:[%s2563_s5 + $0xf8] sm:$0xff] }
  0xe3   :  { %v1203_v41 = vld [vmem:[%s2563_s5 + $0xb8] sm:$0xff]  ;;  %v282_v42 = vmul.f32 %v2043_v33, %v2199_v19  ;;  %v1654_v33 = vld [vmem:[%s2561_s3] ss:$8 sps:$4 sm:$0xff]  }
  0xe4   :  { %v550_v52 = vmax.f32 %v518_v46, 0.0  ;;  %v549_v48 = vmax.f32 %v517_v13, 0.0  ;;  %1530 = vmatpush3.bf16.msra.mxu0 %v591_v10  ;;  %1645 = vmatpush3.bf16.msra.mxu1 %v591_v10 }
  0xe5   :  { %v389_v49 = vpop.permute.xlu1 %388  ;;  %v384_v54 = vpop.permute.xlu0 %383 }
  0xe6   :  { %v600_v55 = vpack.c.bf16 %v550_v52, %v549_v48  ;;  %v502_v58 = vadd.f32 %v389_v49, %v278_v7  ;;  %v501_v59 = vadd.f32 %v384_v54, %v277_v47  ;;  %1274 = vperm.xlu1 %1653, %v1192_v14   ;;  %1309 = vperm.xlu0 %1652, %v1199_v6   ;;  %v1662_v48 = vld [vmem:[%s2561_s3 + $0x94] ss:$8 sps:$4 sm:$0xff]   ;;  %v1664_v49 = vld [vmem:[%s2561_s3 + $0x10] ss:$8 sps:$4 sm:$0xff]  }
  0xe7   :  { %v1665_v54 = vld [vmem:[%s2561_s3 + $0x90] ss:$8 sps:$4 sm:$0xff]  }
  0xe8   :  { %v534_v26 = vmax.f32 %v502_v58, 0.0  ;;  %v533_v56 = vmax.f32 %v501_v59, 0.0  ;;  %1531 = vmatprep.subr.bf16.mxu0 %v600_v55  ;;  %1638 = vmatprep.subr.bf16.mxu1 %v600_v55  ;;  %v1666_v55 = vld [vmem:[%s2561_s3 + $0x24] ss:$8 sps:$4 sm:$0xff]   ;;  %v1670_v59 = vld [vmem:[%s2561_s3 + $0x20] ss:$8 sps:$4 sm:$0xff]  }
  0xe9   :  { %v255_v57 = vpop.permute.xlu1 %254  ;;  %v250_v5 = vpop.permute.xlu0 %249  ;;  %v1668_v58 = vld [vmem:[%s2561_s3 + $0xa4] ss:$8 sps:$4 sm:$0xff]  }
  0xea   :  { %v592_v60 = vpack.c.bf16 %v534_v26, %v533_v56  ;;  %1314 = vperm.xlu1 %1653, %v1200_v44   ;;  %1349 = vperm.xlu0 %1652, %v1207_v25   ;;  %v296_v2 = vmul.f32 %v255_v57, %v2186_v45  ;;  %v295_v8 = vmul.f32 %v250_v5, %v2186_v45  ;;  %v1671_v44 = vld [vmem:[%s2561_s3 + $0xa0] ss:$8 sps:$4 sm:$0xff]   ;;  %v1672_v25 = vld [vmem:[%s2561_s3 + $0x34] ss:$8 sps:$4 sm:$0xff]   ;;  %v1676_v56 = vld [vmem:[%s2561_s3 + $0x30] ss:$8 sps:$4 sm:$0xff]  }
  0xeb   :  { %v1674_v26 = vld [vmem:[%s2561_s3 + $0xb4] ss:$8 sps:$4 sm:$0xff]   ;;  %v1677_v57 = vld [vmem:[%s2561_s3 + $0xb0] ss:$8 sps:$4 sm:$0xff]   ;;  %v1678_v5 = vld [vmem:[%s2561_s3 + $0x44] ss:$8 sps:$4 sm:$0xff]  }
  0xec   :  { %1532 = vmatpush3.bf16.msra.mxu0 %v592_v60  ;;  %1646 = vmatpush3.bf16.msra.mxu1 %v592_v60  ;;  %v1680_v60 = vld [vmem:[%s2561_s3 + $0xc4] ss:$8 sps:$4 sm:$0xff]  }
  0xed   :  { %v479_v11 = vpop.permute.xlu1 %478  ;;  %v474_v15 = vpop.permute.xlu0 %473 }
  0xee   :  { %v520_v16 = vadd.f32 %v479_v11, %v296_v2  ;;  %v519_v17 = vadd.f32 %v474_v15, %v295_v8  ;;  %1354 = vperm.xlu1 %1653, %v1208_v61   ;;  %1279 = vperm.xlu0 %1652, %v1193_v1   ;;  %v1682_v61 = vld [vmem:[%s2561_s3 + $0x40] ss:$8 sps:$4 sm:$0xff]   ;;  %v1684_v2 = vld [vmem:[%s2561_s3 + $0x54] ss:$8 sps:$4 sm:$0xff]   ;;  %v1688_v11 = vld [vmem:[%s2561_s3 + $0x50] ss:$8 sps:$4 sm:$0xff]  }
  0xef   :  { %v1683_v1 = vld [vmem:[%s2561_s3 + $0xc0] ss:$8 sps:$4 sm:$0xff]   ;;  %v1686_v8 = vld [vmem:[%s2561_s3 + $0xd4] ss:$8 sps:$4 sm:$0xff]   ;;  %v1689_v15 = vld [vmem:[%s2561_s3 + $0xd0] ss:$8 sps:$4 sm:$0xff]  }
  0xf0   :  { %v552_v20 = vmax.f32 %v520_v16, 0.0  ;;  %v551_v0 = vmax.f32 %v519_v17, 0.0  ;;  %v1690_v16 = vld [vmem:[%s2561_s3 + $0x64] ss:$8 sps:$4 sm:$0xff]  }
  0xf1   :  { %v399_v23 = vpop.permute.xlu1 %398  ;;  %v394_v24 = vpop.permute.xlu0 %393  ;;  %v1692_v17 = vld [vmem:[%s2561_s3 + $0xe4] ss:$8 sps:$4 sm:$0xff]  }
  0xf2   :  { %v601_v27 = vpack.c.bf16 %v552_v20, %v551_v0  ;;  %v504_v28 = vadd.f32 %v399_v23, %v280_v3  ;;  %v503_v31 = vadd.f32 %v394_v24, %v279_v9  ;;  %1284 = vperm.xlu1 %1653, %v1194_v18   ;;  %1319 = vperm.xlu0 %1652, %v1201_v12   ;;  %v1694_v18 = vld [vmem:[%s2561_s3 + $0x60] ss:$8 sps:$4 sm:$0xff]   ;;  %v1696_v3 = vld [vmem:[%s2561_s3 + $0x74] ss:$8 sps:$4 sm:$0xff]   ;;  %v1700_v0 = vld [vmem:[%s2561_s3 + $0x70] ss:$8 sps:$4 sm:$0xff]  }
  0xf3   :  { %v1695_v12 = vld [vmem:[%s2561_s3 + $0xe0] ss:$8 sps:$4 sm:$0xff]   ;;  %v1698_v9 = vld [vmem:[%s2561_s3 + $0xf4] ss:$8 sps:$4 sm:$0xff]   ;;  %v1701_v23 = vld [vmem:[%s2561_s3 + $0xf0] ss:$8 sps:$4 sm:$0xff]  }
  0xf4   :  { %v536_v63 = vmax.f32 %v504_v28, 0.0  ;;  %v535_v32 = vmax.f32 %v503_v31, 0.0  ;;  %1533 = vmatprep.subr.bf16.mxu0 %v601_v27  ;;  %1639 = vmatprep.subr.bf16.mxu1 %v601_v27 }
  0xf5   :  { %v265_v30 = vpop.permute.xlu1 %264  ;;  %v260_v35 = vpop.permute.xlu0 %259 }
  0xf6   :  { %v593_v36 = vpack.c.bf16 %v536_v63, %v535_v32  ;;  %1324 = vperm.xlu1 %1653, %v1202_v62   ;;  %1359 = vperm.xlu0 %1652, %v1209_v29   ;;  %v298_v37 = vmul.f32 %v265_v30, %v2186_v45  ;;  %v297_v53 = vmul.f32 %v260_v35, %v2186_v45 }
  0xf7   :  { %v281_v45 = vmul.f32 %v2045_v34, %v2199_v19  ;;  %v1657_v34 = vld [vmem:[%s2561_s3 + $0x80] ss:$8 sps:$4 sm:$0xff]   ;;  %v1660_v19 = vld [vmem:[%s2561_s3 + $0x14] ss:$8 sps:$4 sm:$0xff]  }
  0xf8   :  { %1534 = vmatpush3.bf16.msra.mxu0 %v593_v36  ;;  %1647 = vmatpush3.bf16.msra.mxu1 %v593_v36 }
  0xf9   :  { %v489_v38 = vpop.permute.xlu1 %488  ;;  %v484_v39 = vpop.permute.xlu0 %483 }
  0xfa   :  { %v522_v21 = vadd.f32 %v489_v38, %v298_v37  ;;  %v521_v22 = vadd.f32 %v484_v39, %v297_v53  ;;  %1364 = vperm.xlu1 %1653, %v1210_v50   ;;  %1289 = vperm.xlu0 %1652, %v1195_v51  }
  0xfc   :  { %v554_v4 = vmax.f32 %v522_v21, 0.0  ;;  %v553_v43 = vmax.f32 %v521_v22, 0.0 }
  0xfd   :  { %v409_v10 = vpop.permute.xlu1 %408  ;;  %v404_v46 = vpop.permute.xlu0 %403 }
  0xfe   :  { %v602_v13 = vpack.c.bf16 %v554_v4, %v553_v43  ;;  %v506_v14 = vadd.f32 %v409_v10, %v282_v42  ;;  %v505_v6 = vadd.f32 %v404_v46, %v281_v45  ;;  %1369 = vperm.xlu1 %1653, %v1211_v40   ;;  %1329 = vperm.xlu0 %1652, %v1203_v41  }
 0x100   :  { %v538_v7 = vmax.f32 %v506_v14, 0.0  ;;  %v537_v47 = vmax.f32 %v505_v6, 0.0  ;;  %1535 = vmatprep.subr.bf16.mxu0 %v602_v13  ;;  %1640 = vmatprep.subr.bf16.mxu1 %v602_v13 }
 0x101   :  { %v2373_v20 = vpop.permute.xlu0 %958  ;;  %v2383_v27 = vpop.permute.xlu1 %963 }
 0x102   :  { %v594_v52 = vpack.c.bf16 %v538_v7, %v537_v47 }
 0x104   :  { %1536 = vmatpush3.bf16.msra.mxu0 %v594_v52  ;;  %1648 = vmatpush3.bf16.msra.mxu1 %v594_v52 }
 0x105   :  { %v2381_v24 = vpop.permute.xlu0 %968  ;;  %v2387_v31 = vpop.permute.xlu1 %973 }
 0x107   :  { %796 = vmatmul.mubr.bf16.vlgmr.msra.gmra.mrb[0].mxu0 %v1654_v33  ;;  %860 = vmatmul.mubr.bf16.vlgmr.msra.gmra.mrb[0].mxu1 %v1657_v34 }
 0x108   :  { %803 = vmatprep.mubr.bf16.mxu0 %v1660_v19  ;;  %867 = vmatprep.mubr.bf16.mxu1 %v1662_v48 }
 0x109   :  { %v2385_v28 = vpop.permute.xlu0 %978  ;;  %v2391_v29 = vpop.permute.xlu1 %983 }
 0x10d   :  { %v2389_v62 = vpop.permute.xlu0 %988  ;;  %v2395_v32 = vpop.permute.xlu1 %993 }
 0x10f   :  { %804 = vmatmul.mubr.bf16.gmra.mrb[4].mxu0 %v1664_v49  ;;  %868 = vmatmul.mubr.bf16.gmra.mrb[4].mxu1 %v1665_v54 }
 0x110   :  { %811 = vmatprep.mubr.bf16.mxu0 %v1666_v55  ;;  %875 = vmatprep.mubr.bf16.mxu1 %v1668_v58 }
 0x111   :  { %v2393_v63 = vpop.permute.xlu0 %998  ;;  %v2399_v35 = vpop.permute.xlu1 %1003 }
 0x115   :  { %v2397_v30 = vpop.permute.xlu0 %1008  ;;  %v2403_v50 = vpop.permute.xlu1 %1013 }
 0x117   :  { %812 = vmatmul.mubr.bf16.gmra.mrb[8].mxu0 %v1670_v59  ;;  %876 = vmatmul.mubr.bf16.gmra.mrb[8].mxu1 %v1671_v44 }
 0x118   :  { %819 = vmatprep.mubr.bf16.mxu0 %v1672_v25  ;;  %883 = vmatprep.mubr.bf16.mxu1 %v1674_v26 }
 0x119   :  { %v2401_v36 = vpop.permute.xlu0 %1018  ;;  %v2407_v37 = vpop.permute.xlu1 %1023 }
 0x11a   :  { %2566 = vst [vmem:[#allocation6_spill] sm:$0xff] %v2401_v36  ;;  %2568 = vst [vmem:[#allocation8_spill] sm:$0xff] %v2407_v37 }
 0x11d   :  { %v2405_v51 = vpop.permute.xlu0 %1028  ;;  %v2409_v38 = vpop.permute.xlu1 %1033 }
 0x11e   :  { %2567 = vst [vmem:[#allocation7_spill] sm:$0xff] %v2405_v51  ;;  %2569 = vst [vmem:[#allocation9_spill] sm:$0xff] %v2409_v38 }
 0x11f   :  { %820 = vmatmul.mubr.bf16.gmra.mrb[12].mxu0 %v1676_v56  ;;  %884 = vmatmul.mubr.bf16.gmra.mrb[12].mxu1 %v1677_v57 }
 0x120   :  { %827 = vmatprep.mubr.bf16.mxu0 %v1678_v5  ;;  %891 = vmatprep.mubr.bf16.mxu1 %v1680_v60 }
 0x121   :  { %v1039_v53 = vpop.permute.xlu0 %1038  ;;  %v1044_v21 = vpop.permute.xlu1 %1043 }
 0x125   :  { %v2411_v39 = vpop.permute.xlu0 %1048  ;;  %v2415_v40 = vpop.permute.xlu1 %1053 }
 0x127   :  { %828 = vmatmul.mubr.bf16.gmra.mrb[16].mxu0 %v1682_v61  ;;  %892 = vmatmul.mubr.bf16.gmra.mrb[16].mxu1 %v1683_v1 }
 0x128   :  { %835 = vmatprep.mubr.bf16.mxu0 %v1684_v2  ;;  %899 = vmatprep.mubr.bf16.mxu1 %v1686_v8 }
 0x129   :  { %v2413_v22 = vpop.permute.xlu0 %1058  ;;  %v2419_v42 = vpop.permute.xlu1 %1063 }
 0x12d   :  { %v2417_v41 = vpop.permute.xlu0 %1068  ;;  %v2423_v4 = vpop.permute.xlu1 %1073 }
 0x12f   :  { %836 = vmatmul.mubr.bf16.gmra.mrb[20].mxu0 %v1688_v11  ;;  %900 = vmatmul.mubr.bf16.gmra.mrb[20].mxu1 %v1689_v15 }
 0x130   :  { %843 = vmatprep.mubr.bf16.mxu0 %v1690_v16  ;;  %907 = vmatprep.mubr.bf16.mxu1 %v1692_v17 }
 0x131   :  { %v2421_v45 = vpop.permute.xlu0 %1078  ;;  %v2427_v10 = vpop.permute.xlu1 %1083 }
 0x135   :  { %v2425_v43 = vpop.permute.xlu0 %1088  ;;  %v2431_v13 = vpop.permute.xlu1 %1093 }
 0x137   :  { %844 = vmatmul.mubr.bf16.gmra.mrb[24].mxu0 %v1694_v18  ;;  %908 = vmatmul.mubr.bf16.gmra.mrb[24].mxu1 %v1695_v12 }
 0x138   :  { %851 = vmatprep.mubr.bf16.mxu0 %v1696_v3  ;;  %915 = vmatprep.mubr.bf16.mxu1 %v1698_v9 }
 0x139   :  { %v2429_v46 = vpop.permute.xlu0 %1098  ;;  %v2435_v6 = vpop.permute.xlu1 %1103 }
 0x13a   :  { %2570 = vst [vmem:[#allocation10_spill] sm:$0xff] %v2429_v46  ;;  %2572 = vst [vmem:[#allocation12_spill] sm:$0xff] %v2435_v6 }
 0x13d   :  { %v2433_v14 = vpop.permute.xlu0 %1108  ;;  %v2437_v47 = vpop.permute.xlu1 %1113 }
 0x13e   :  { %2571 = vst [vmem:[#allocation11_spill] sm:$0xff] %v2433_v14  ;;  %2573 = vst [vmem:[#allocation13_spill] sm:$0xff] %v2437_v47 }
 0x13f   :  { %852 = vmatmul.mubr.bf16.gmra.mrb[28].mxu0 %v1700_v0  ;;  %916 = vmatmul.mubr.bf16.gmra.mrb[28].mxu1 %v1701_v23 }
 0x141   :  { %v1215_v7 = vpop.permute.xlu0 %1214  ;;  %v1220_v33 = vpop.permute.xlu1 %1219 }
 0x145   :  { %v2439_v52 = vpop.permute.xlu0 %1224  ;;  %v2443_v19 = vpop.permute.xlu1 %1229 }
 0x149   :  { %v2441_v34 = vpop.permute.xlu0 %1234  ;;  %v2447_v49 = vpop.permute.xlu1 %1239 }
 0x14d   :  { %v2445_v48 = vpop.permute.xlu0 %1244  ;;  %v2451_v55 = vpop.permute.xlu1 %1249 }
 0x151   :  { %v2449_v54 = vpop.permute.xlu0 %1254  ;;  %v2453_v59 = vpop.permute.xlu1 %1259 }
 0x155   :  { %v1295_v58 = vpop.permute.xlu0 %1294  ;;  %v1300_v25 = vpop.permute.xlu1 %1299 }
 0x159   :  { %v2455_v44 = vpop.permute.xlu0 %1264  ;;  %v2459_v56 = vpop.permute.xlu1 %1334 }
 0x15a   :  { %2574 = vst [vmem:[#allocation14_spill] sm:$0xff] %v2455_v44 }
 0x15d   :  { %v2457_v26 = vpop.permute.xlu0 %1339  ;;  %v1305_v5 = vpop.permute.xlu1 %1304 }
 0x161   :  { %v2461_v57 = vpop.permute.xlu0 %1269  ;;  %v2465_v61 = vpop.permute.xlu1 %1344 }
 0x162   :  { %2575 = vst [vmem:[#allocation15_spill] sm:$0xff] %v2461_v57  ;;  %2576 = vst [vmem:[#allocation16_spill] sm:$0xff] %v2465_v61 }
 0x165   :  { %v2463_v60 = vpop.permute.xlu0 %1309  ;;  %v2469_v2 = vpop.permute.xlu1 %1274 }
 0x166   :  { %2578 = vst [vmem:[#allocation18_spill] sm:$0xff] %v2469_v2 }
 0x169   :  { %v2467_v1 = vpop.permute.xlu0 %1349  ;;  %v1315_v46 = vpop.permute.xlu1 %1314 }
 0x16a   :  { %2577 = vst [vmem:[#allocation17_spill] sm:$0xff] %v2467_v1 }
 0x16d   :  { %v2471_v8 = vpop.permute.xlu0 %1279 }
 0x16e   :  { %2579 = vst [vmem:[#allocation19_spill] sm:$0xff] %v2471_v8 }
 0x171   :  { %v2475_v36 = vpop.permute.xlu0 %1319 }
 0x1da   :  { %v1537_v11 = vpop.f32.mrb[0].mxu0  ;;  %v1585_v15 = vpop.f32.mrb[0].mxu1 }
 0x1db   :  { %v1538_v16 = vpop.f32.mrb[1].mxu0  ;;  %v1586_v17 = vpop.f32.mrb[1].mxu1 }
 0x1dc   :  { %v1539_v18 = vadd.f32 %v1538_v16, %v1537_v11  ;;  %v1587_v12 = vadd.f32 %v1586_v17, %v1585_v15  ;;  %v1540_v3 = vpop.f32.mrb[2].mxu0  ;;  %v1588_v9 = vpop.f32.mrb[2].mxu1 }
 0x1dd   :  { %v1541_v0 = vpop.f32.mrb[3].mxu0  ;;  %v1589_v23 = vpop.f32.mrb[3].mxu1 }
 0x1de   :  { %v1116_v47 = vadd.f32 %v1539_v18, %v2373_v20  ;;  %v1132_v38 = vadd.f32 %v1587_v12, %v1039_v53  ;;  %v1542_v14 = vadd.f32 %v1541_v0, %v1540_v3  ;;  %v1590_v51 = vadd.f32 %v1589_v23, %v1588_v9 }
 0x1e0   :  { %v1148_v6 = vmax.f32 %v1116_v47, 0.0  ;;  %v1164_v37 = vmax.f32 %v1132_v38, 0.0  ;;  %v1117_v2 = vadd.f32 %v1542_v14, %v2383_v27  ;;  %v1133_v8 = vadd.f32 %v1590_v51, %v1044_v21 }
 0x1e2   :  { %v1149_v1 = vmax.f32 %v1117_v2, 0.0  ;;  %v1165_v11 = vmax.f32 %v1133_v8, 0.0  ;;  %v1543_v15 = vpop.f32.mrb[4].mxu0  ;;  %v1591_v16 = vpop.f32.mrb[4].mxu1  ;;  %v1372_v17 = vmul.f32 %v1215_v7, %v1148_v6  ;;  %v1388_v57 = vmul.f32 %v1295_v58, %v1164_v37 }
 0x1e3   :  { %v1544_v61 = vpop.f32.mrb[5].mxu0  ;;  %v1592_v44 = vpop.f32.mrb[5].mxu1 }
 0x1e4   :  { %v1373_v20 = vmul.f32 %v1220_v33, %v1149_v1  ;;  %v1389_v53 = vmul.f32 %v1300_v25, %v1165_v11  ;;  %v1545_v18 = vadd.f32 %v1544_v61, %v1543_v15  ;;  %v1593_v12 = vadd.f32 %v1592_v44, %v1591_v16  ;;  %v1546_v47 = vpop.f32.mrb[6].mxu0  ;;  %v1594_v38 = vpop.f32.mrb[6].mxu1 }
 0x1e5   :  { %v1547_v3 = vpop.f32.mrb[7].mxu0  ;;  %v1595_v27 = vpop.f32.mrb[7].mxu1 }
 0x1e6   :  { %v1404_v51 = vadd.f32 %v1373_v20, %v1372_v17  ;;  %v1430_v21 = vadd.f32 %v1389_v53, %v1388_v57  ;;  %v1118_v14 = vadd.f32 %v1545_v18, %v2381_v24  ;;  %v1134_v2 = vadd.f32 %v1593_v12, %v2411_v39  ;;  %v2479_v7 = vpop.permute.xlu1 %1354  ;;  %v2481_v33 = vpop.permute.xlu0 %1359 }
 0x1e7   :  { %v1548_v8 = vadd.f32 %v1547_v3, %v1546_v47  ;;  %v1596_v9 = vadd.f32 %v1595_v27, %v1594_v38 }
 0x1e8   :  { %v1150_v6 = vmax.f32 %v1118_v14, 0.0  ;;  %v1166_v37 = vmax.f32 %v1134_v2, 0.0 }
 0x1e9   :  { %v1119_v58 = vadd.f32 %v1548_v8, %v2387_v31  ;;  %v1135_v44 = vadd.f32 %v1596_v9, %v2415_v40 }
 0x1ea   :  { %v1374_v25 = vmul.f32 %v2439_v52, %v1150_v6  ;;  %v1390_v61 = vmul.f32 %v1305_v5, %v1166_v37  ;;  %v1549_v57 = vpop.f32.mrb[8].mxu0  ;;  %v1597_v1 = vpop.f32.mrb[8].mxu1 }
 0x1eb   :  { %v1151_v24 = vmax.f32 %v1119_v58, 0.0  ;;  %v1167_v0 = vmax.f32 %v1135_v44, 0.0  ;;  %v1550_v39 = vpop.f32.mrb[9].mxu0  ;;  %v1598_v23 = vpop.f32.mrb[9].mxu1 }
 0x1ec   :  { %v1405_v11 = vadd.f32 %v1404_v51, %v1374_v25  ;;  %v1431_v15 = vadd.f32 %v1430_v21, %v1390_v61  ;;  %v1551_v16 = vadd.f32 %v1550_v39, %v1549_v57  ;;  %v1599_v17 = vadd.f32 %v1598_v23, %v1597_v1  ;;  %v1552_v20 = vpop.f32.mrb[10].mxu0  ;;  %v1600_v53 = vpop.f32.mrb[10].mxu1 }
 0x1ed   :  { %v1375_v18 = vmul.f32 %v2443_v19, %v1151_v24  ;;  %v1391_v31 = vmul.f32 %v2463_v60, %v1167_v0  ;;  %v1553_v40 = vpop.f32.mrb[11].mxu0  ;;  %v1601_v12 = vpop.f32.mrb[11].mxu1 }
 0x1ee   :  { %v1120_v52 = vadd.f32 %v1551_v16, %v2385_v28  ;;  %v1136_v5 = vadd.f32 %v1599_v17, %v2413_v22  ;;  %v1554_v47 = vadd.f32 %v1553_v40, %v1552_v20  ;;  %v1602_v38 = vadd.f32 %v1601_v12, %v1600_v53  ;;  %v2492_v8 = vpop.permute.xlu1 %1284  ;;  %v2494_v19 = vpop.permute.xlu0 %1289 }
 0x1ef   :  { %v1406_v3 = vadd.f32 %v1405_v11, %v1375_v18  ;;  %v1432_v27 = vadd.f32 %v1431_v15, %v1391_v31 }
 0x1f0   :  { %v1152_v51 = vmax.f32 %v1120_v52, 0.0  ;;  %v1168_v21 = vmax.f32 %v1136_v5, 0.0  ;;  %v1121_v14 = vadd.f32 %v1554_v47, %v2391_v29  ;;  %v1137_v2 = vadd.f32 %v1602_v38, %v2419_v42 }
 0x1f2   :  { %v1376_v60 = vmul.f32 %v2441_v34, %v1152_v51  ;;  %v1392_v9 = vmul.f32 %v1315_v46, %v1168_v21  ;;  %v1153_v28 = vmax.f32 %v1121_v14, 0.0  ;;  %v1169_v6 = vmax.f32 %v1137_v2, 0.0  ;;  %v1555_v22 = vpop.f32.mrb[12].mxu0  ;;  %v1603_v37 = vpop.f32.mrb[12].mxu1 }
 0x1f3   :  { %v1556_v58 = vpop.f32.mrb[13].mxu0  ;;  %v1604_v44 = vpop.f32.mrb[13].mxu1 }
 0x1f4   :  { %v1407_v25 = vadd.f32 %v1406_v3, %v1376_v60  ;;  %v1433_v61 = vadd.f32 %v1432_v27, %v1392_v9  ;;  %v1377_v57 = vmul.f32 %v2447_v49, %v1153_v28  ;;  %v1393_v29 = vmul.f32 %v2475_v36, %v1169_v6  ;;  %v1558_v42 = vpop.f32.mrb[14].mxu0  ;;  %v1606_v1 = vpop.f32.mrb[14].mxu1 }
 0x1f5   :  { %v1557_v24 = vadd.f32 %v1556_v58, %v1555_v22  ;;  %v1605_v0 = vadd.f32 %v1604_v44, %v1603_v37  ;;  %v1559_v39 = vpop.f32.mrb[15].mxu0  ;;  %v1607_v23 = vpop.f32.mrb[15].mxu1 }
 0x1f6   :  { %v1408_v34 = vadd.f32 %v1407_v25, %v1377_v57  ;;  %v1434_v46 = vadd.f32 %v1433_v61, %v1393_v29  ;;  %v1560_v11 = vadd.f32 %v1559_v39, %v1558_v42  ;;  %v1608_v15 = vadd.f32 %v1607_v23, %v1606_v1  ;;  %v1325_v53 = vpop.permute.xlu1 %1324  ;;  %v1330_v36 = vpop.permute.xlu0 %1329 }
 0x1f7   :  { %v1122_v16 = vadd.f32 %v1557_v24, %v2389_v62  ;;  %v1138_v17 = vadd.f32 %v1605_v0, %v2417_v41 }
 0x1f8   :  { %v1123_v20 = vadd.f32 %v1560_v11, %v2395_v32  ;;  %v1139_v49 = vadd.f32 %v1608_v15, %v2423_v4 }
 0x1f9   :  { %v1154_v18 = vmax.f32 %v1122_v16, 0.0  ;;  %v1170_v31 = vmax.f32 %v1138_v17, 0.0 }
 0x1fa   :  { %v1155_v40 = vmax.f32 %v1123_v20, 0.0  ;;  %v1171_v12 = vmax.f32 %v1139_v49, 0.0  ;;  %v1561_v52 = vpop.f32.mrb[16].mxu0  ;;  %v1609_v5 = vpop.f32.mrb[16].mxu1 }
 0x1fb   :  { %v1378_v47 = vmul.f32 %v2445_v48, %v1154_v18  ;;  %v1394_v38 = vmul.f32 %v1325_v53, %v1170_v31  ;;  %v1562_v3 = vpop.f32.mrb[17].mxu0  ;;  %v1610_v27 = vpop.f32.mrb[17].mxu1  ;;  %v2580_v18 = vld [vmem:[#allocation14_spill] sm:$0xff] }
 0x1fc   :  { %v1379_v62 = vmul.f32 %v2451_v55, %v1155_v40  ;;  %v1395_v41 = vmul.f32 %v1330_v36, %v1171_v12  ;;  %v1563_v51 = vadd.f32 %v1562_v3, %v1561_v52  ;;  %v1611_v32 = vadd.f32 %v1610_v27, %v1609_v5  ;;  %v1564_v21 = vpop.f32.mrb[18].mxu0  ;;  %v1612_v4 = vpop.f32.mrb[18].mxu1  ;;  %v2581_v40 = vld [vmem:[#allocation16_spill] sm:$0xff] }
 0x1fd   :  { %v1409_v14 = vadd.f32 %v1408_v34, %v1378_v47  ;;  %v1435_v2 = vadd.f32 %v1434_v46, %v1394_v38  ;;  %v1565_v60 = vpop.f32.mrb[19].mxu0  ;;  %v1613_v9 = vpop.f32.mrb[19].mxu1 }
 0x1fe   :  { %v1124_v28 = vadd.f32 %v1563_v51, %v2393_v63  ;;  %v1140_v6 = vadd.f32 %v1611_v32, %v2421_v45  ;;  %v1566_v22 = vadd.f32 %v1565_v60, %v1564_v21  ;;  %v1614_v48 = vadd.f32 %v1613_v9, %v1612_v4  ;;  %v2582_v21 = vld [vmem:[#allocation15_spill] sm:$0xff]  ;;  %v2583_v4 = vld [vmem:[#allocation17_spill] sm:$0xff]  ;;  %v2584_v60 = vld [vmem:[#allocation6_spill] sm:$0xff] }
 0x1ff   :  { %v2507_v37 = vadd.f32 %v1409_v14, %v1379_v62  ;;  %v2509_v58 = vadd.f32 %v1435_v2, %v1395_v41 }
 0x200   :  { %v1156_v55 = vmax.f32 %v1124_v28, 0.0  ;;  %v1172_v44 = vmax.f32 %v1140_v6, 0.0  ;;  %v1125_v25 = vadd.f32 %v1566_v22, %v2399_v35  ;;  %v1141_v61 = vadd.f32 %v1614_v48, %v2427_v10  ;;  %v2585_v28 = vld [vmem:[#allocation10_spill] sm:$0xff] }
 0x202   :  { %v1157_v57 = vmax.f32 %v1125_v25, 0.0  ;;  %v1173_v29 = vmax.f32 %v1141_v61, 0.0  ;;  %v1567_v42 = vpop.f32.mrb[20].mxu0  ;;  %v1615_v1 = vpop.f32.mrb[20].mxu1  ;;  %v1380_v63 = vmul.f32 %v2449_v54, %v1156_v55  ;;  %v1396_v45 = vmul.f32 %v2459_v56, %v1172_v44 }
 0x203   :  { %v1568_v24 = vpop.f32.mrb[21].mxu0  ;;  %v1616_v0 = vpop.f32.mrb[21].mxu1 }
 0x204   :  { %v1381_v39 = vmul.f32 %v2453_v59, %v1157_v57  ;;  %v1397_v23 = vmul.f32 %v2457_v26, %v1173_v29  ;;  %v1569_v34 = vadd.f32 %v1568_v24, %v1567_v42  ;;  %v1617_v46 = vadd.f32 %v1616_v0, %v1615_v1  ;;  %v1570_v11 = vpop.f32.mrb[22].mxu0  ;;  %v1618_v35 = vpop.f32.mrb[22].mxu1  ;;  %v2586_v57 = vld [vmem:[#allocation8_spill] sm:$0xff] }
 0x205   :  { %v1571_v15 = vpop.f32.mrb[23].mxu0  ;;  %v1619_v10 = vpop.f32.mrb[23].mxu1  ;;  %v2587_v42 = vld [vmem:[#allocation12_spill] sm:$0xff] }
 0x206   :  { %v1417_v16 = vadd.f32 %v1381_v39, %v1380_v63  ;;  %v1443_v17 = vadd.f32 %v1397_v23, %v1396_v45  ;;  %v1126_v20 = vadd.f32 %v1569_v34, %v2397_v30  ;;  %v1142_v54 = vadd.f32 %v1617_v46, %v2425_v43  ;;  %v1365_v63 = vpop.permute.xlu1 %1364  ;;  %v2588_v45 = vld [vmem:[#allocation18_spill] sm:$0xff] }
 0x207   :  { %v1572_v49 = vadd.f32 %v1571_v15, %v1570_v11  ;;  %v1620_v56 = vadd.f32 %v1619_v10, %v1618_v35 }
 0x208   :  { %v1158_v53 = vmax.f32 %v1126_v20, 0.0  ;;  %v1174_v36 = vmax.f32 %v1142_v54, 0.0 }
 0x209   :  { %v1127_v59 = vadd.f32 %v1572_v49, %v2403_v50  ;;  %v1143_v26 = vadd.f32 %v1620_v56, %v2431_v13  ;;  %v1411_v56 = vrot.slane %v2507_v37, 4 }
 0x20a   :  { %v1382_v31 = vmul.f32 %v2580_v18, %v1158_v53  ;;  %v1398_v12 = vmul.f32 %v2581_v40, %v1174_v36  ;;  %v1573_v52 = vpop.f32.mrb[24].mxu0  ;;  %v1621_v5 = vpop.f32.mrb[24].mxu1  ;;  %v1437_v53 = vrot.slane %v2509_v58, 4 }
 0x20b   :  { %v1159_v47 = vmax.f32 %v1127_v59, 0.0  ;;  %v1175_v38 = vmax.f32 %v1143_v26, 0.0  ;;  %v1574_v3 = vpop.f32.mrb[25].mxu0  ;;  %v1622_v30 = vpop.f32.mrb[25].mxu1 }
 0x20c   :  { %v1418_v27 = vadd.f32 %v1417_v16, %v1382_v31  ;;  %v1444_v43 = vadd.f32 %v1443_v17, %v1398_v12  ;;  %v1575_v62 = vadd.f32 %v1574_v3, %v1573_v52  ;;  %v1623_v41 = vadd.f32 %v1622_v30, %v1621_v5  ;;  %v1576_v51 = vpop.f32.mrb[26].mxu0  ;;  %v1624_v32 = vpop.f32.mrb[26].mxu1  ;;  %v2589_v16 = vld [vmem:[#allocation19_spill] sm:$0xff]  ;;  %v2592_v3 = vld [vmem:[#allocation9_spill] sm:$0xff] }
 0x20d   :  { %v1383_v50 = vmul.f32 %v2582_v21, %v1159_v47  ;;  %v1399_v13 = vmul.f32 %v2583_v4, %v1175_v38  ;;  %v1577_v14 = vpop.f32.mrb[27].mxu0  ;;  %v1625_v2 = vpop.f32.mrb[27].mxu1  ;;  %v2590_v52 = vld [vmem:[#allocation7_spill] sm:$0xff]  ;;  %v2593_v30 = vld [vmem:[#allocation13_spill] sm:$0xff] }
 0x20e   :  { %v1128_v9 = vadd.f32 %v1575_v62, %v2584_v60  ;;  %v1144_v6 = vadd.f32 %v1623_v41, %v2585_v28  ;;  %v1578_v22 = vadd.f32 %v1577_v14, %v1576_v51  ;;  %v1626_v48 = vadd.f32 %v1625_v2, %v1624_v32  ;;  %v2591_v47 = vld [vmem:[#allocation11_spill] sm:$0xff] }
 0x20f   :  { %v1419_v55 = vadd.f32 %v1418_v27, %v1383_v50  ;;  %v1445_v44 = vadd.f32 %v1444_v43, %v1399_v13  ;;  %v1412_v43 = vadd.f32 %v1411_v56, %v2507_v37  ;;  %v1438_v51 = vadd.f32 %v1437_v53, %v2509_v58  ;;  %v1370_v50 = vpop.permute.xlu1 %1369 }
 0x210   :  { %v1160_v25 = vmax.f32 %v1128_v9, 0.0  ;;  %v1176_v61 = vmax.f32 %v1144_v6, 0.0  ;;  %v1129_v29 = vadd.f32 %v1578_v22, %v2586_v57  ;;  %v1145_v1 = vadd.f32 %v1626_v48, %v2587_v42 }
 0x211   :  { %v1413_v60 = vrot.slane %v1412_v43, 2  ;;  %v1439_v6 = vrot.slane %v1438_v51, 2 }
 0x212   :  { %v1384_v24 = vmul.f32 %v2588_v45, %v1160_v25  ;;  %v1400_v0 = vmul.f32 %v2479_v7, %v1176_v61  ;;  %v1161_v39 = vmax.f32 %v1129_v29, 0.0  ;;  %v1177_v23 = vmax.f32 %v1145_v1, 0.0  ;;  %v1579_v34 = vpop.f32.mrb[28].mxu0  ;;  %v1627_v46 = vpop.f32.mrb[28].mxu1 }
 0x213   :  { %v1580_v11 = vpop.f32.mrb[29].mxu0  ;;  %v1628_v35 = vpop.f32.mrb[29].mxu1  ;;  %v1414_v37 = vadd.f32 %v1413_v60, %v1412_v43  ;;  %v1440_v25 = vadd.f32 %v1439_v6, %v1438_v51 }
 0x214   :  { %v1420_v15 = vadd.f32 %v1419_v55, %v1384_v24  ;;  %v1446_v10 = vadd.f32 %v1445_v44, %v1400_v0  ;;  %v1385_v17 = vmul.f32 %v2589_v16, %v1161_v39  ;;  %v1401_v20 = vmul.f32 %v2481_v33, %v1177_v23  ;;  %v1582_v54 = vpop.f32.mrb[30].mxu0  ;;  %v1630_v49 = vpop.f32.mrb[30].mxu1 }
 0x215   :  { %v1581_v36 = vadd.f32 %v1580_v11, %v1579_v34  ;;  %v1629_v7 = vadd.f32 %v1628_v35, %v1627_v46  ;;  %v1583_v59 = vpop.f32.mrb[31].mxu0  ;;  %v1631_v26 = vpop.f32.mrb[31].mxu1  ;;  %v1415_v57 = vrot.slane %v1414_v37, 1  ;;  %v1457_v39 = vstv %s2564_s6 }
 0x216   :  { %v1421_v18 = vadd.f32 %v1420_v15, %v1385_v17  ;;  %v1447_v31 = vadd.f32 %v1446_v10, %v1401_v20  ;;  %v1584_v40 = vadd.f32 %v1583_v59, %v1582_v54  ;;  %v1632_v12 = vadd.f32 %v1631_v26, %v1630_v49 }
 0x217   :  { %v1130_v5 = vadd.f32 %v1581_v36, %v2590_v52  ;;  %v1146_v38 = vadd.f32 %v1629_v7, %v2591_v47  ;;  %v1416_v45 = vadd.f32 %v1415_v57, %v1414_v37 }
 0x218   :  { %v1131_v33 = vadd.f32 %v1584_v40, %v2592_v3  ;;  %v1147_v27 = vadd.f32 %v1632_v12, %v2593_v30 }
 0x219   :  { %v1162_v62 = vmax.f32 %v1130_v5, 0.0  ;;  %v1178_v41 = vmax.f32 %v1146_v38, 0.0  ;;  %v1458_v46 = vadd.f32 %v1457_v39, %v1416_v45 }
 0x21a   :  { %v1163_v32 = vmax.f32 %v1131_v33, 0.0  ;;  %v1179_v21 = vmax.f32 %v1147_v27, 0.0 }
 0x21b   :  { %v1386_v4 = vmul.f32 %v2492_v8, %v1162_v62  ;;  %v1402_v13 = vmul.f32 %v1365_v63, %v1178_v41  ;;  %v1441_v8 = vrot.slane %v1440_v25, 1 }
 0x21c   :  { %v1387_v14 = vmul.f32 %v2494_v19, %v1163_v32  ;;  %v1403_v2 = vmul.f32 %v1370_v50, %v1179_v21 }
 0x21d   :  { %v1422_v9 = vadd.f32 %v1421_v18, %v1386_v4  ;;  %v1448_v28 = vadd.f32 %v1447_v31, %v1402_v13  ;;  %v1442_v0 = vadd.f32 %v1441_v8, %v1440_v25 }
 0x21f   :  { %v1423_v22 = vadd.f32 %v1422_v9, %v1387_v14  ;;  %v1449_v48 = vadd.f32 %v1448_v28, %v1403_v2  ;;  %v1460_v35 = vadd.f32 %v1457_v39, %v1442_v0 }
 0x221   :  { %v1424_v55 = vrot.slane %v1423_v22, 4  ;;  %v1450_v44 = vrot.slane %v1449_v48, 4 }
 0x223   :  { %v1425_v58 = vadd.f32 %v1424_v55, %v1423_v22  ;;  %v1451_v61 = vadd.f32 %v1450_v44, %v1449_v48 }
 0x225   :  { %v1426_v29 = vrot.slane %v1425_v58, 2  ;;  %v1452_v42 = vrot.slane %v1451_v61, 2 }
 0x227   :  { %v1427_v1 = vadd.f32 %v1426_v29, %v1425_v58  ;;  %v1453_v63 = vadd.f32 %v1452_v42, %v1451_v61 }
 0x229   :  { %v1428_v19 = vrot.slane %v1427_v1, 1  ;;  %v1454_v24 = vrot.slane %v1453_v63, 1 }
 0x22b   :  { %v1429_v23 = vadd.f32 %v1428_v19, %v1427_v1  ;;  %v1455_v34 = vadd.f32 %v1454_v24, %v1453_v63 }
 0x22d   :  { %v1459_v11 = vadd.f32 %v1457_v39, %v1429_v23  ;;  %v1461_v15 = vadd.f32 %v1457_v39, %v1455_v34 }
 0x22f   :  { %v1467_v10 = vsel %vm1466_vm0, %v1459_v11, %v1458_v46 }
 0x230   :  { %v1469_v16 = vsel %vm1468_vm1, %v1460_v35, %v1467_v10 }
 0x231   :  { %v1471_v17 = vsel %vm1470_vm2, %v1461_v15, %v1469_v16 }
 0x232   :  { %1473 = vst [vmem:[#allocation3] sm:$0xf] %v1471_v17 }
 0x233   :  { %1713 = shalt.err (!%p1710_p4)
}
 0x234   :  { %s1714_s22 = scalar_lea.hbm %s2565_s7, 64 }
 0x235   :  { %p1715_p5 = scmp.ne.s32.totalorder %s2565_s7, %s1714_s22  ;;  %p1718_p6 = scmp.lt.u32.totalorder %s1714_s22, %s2565_s7 }
 0x237   :  { %p1720_p7 = pnand %p1718_p6, %p1715_p5 }
 0x239   :  { %1723 = shalt.err (!%p1720_p7)
}
 0x23a   :  { %1483 = dma.vmem_to_hbm [thread:$0]  %s1481_s19, 64, %s2565_s7, [#allocation4]  }
 0x23b   :  { %1724 = dma.done.wait [#allocation4], 64  }
 0x23c   :  { %1725 = vsyncadd [#allocation4], 4294967232 }
 0x23d   :  { %1487 = vsyncpa [#allocation4], 1 }

</bundles_post_ra>
